<compile_context>
chip_gen: v7x
topology: tpu7x:2x2x1
jax: 0.10.0
libtpu: 0.0.40
codegen_flags: <defaults>
</compile_context>

<pallas_src>
import functools

import numpy as np
import jax
import jax.numpy as jnp
from jax.experimental import pallas as pl
from jax.experimental.pallas import tpu as pltpu


# ----------------------------------------------------------------------------
# Host-side (trace-time) constants
# ----------------------------------------------------------------------------
def _interp_matrix(n_out, n_in):
    """Interpolation matrix of nn.Upsample(mode='bilinear', align_corners=True)."""
    if n_in == 1:
        return np.ones((n_out, 1), np.float32)
    src = np.arange(n_out, dtype=np.float64) * (n_in - 1) / (n_out - 1)
    lo = np.clip(np.floor(src).astype(np.int64), 0, n_in - 2)
    frac = (src - lo).astype(np.float32)
    m = np.zeros((n_out, n_in), np.float32)
    rows = np.arange(n_out)
    m[rows, lo] += 1.0 - frac
    m[rows, lo + 1] += frac
    return m


def _tap_masks(h, w):
    """(9, h*w) {0,1} masks: mask[k, y*w+x] == 1 iff input (y+dy, x+dx) is in-bounds,
    k = (dy+1)*3 + (dx+1).  Zeroes the wrap-around of the lane rolls = the conv halo."""
    yy, xx = np.meshgrid(np.arange(h), np.arange(w), indexing="ij")
    m = np.empty((9, h, w), np.float32)
    for ky in range(3):
        for kx in range(3):
            dy, dx = ky - 1, kx - 1
            ok = (yy + dy >= 0) & (yy + dy < h) & (xx + dx >= 0) & (xx + dx < w)
            m[ky * 3 + kx] = ok.astype(np.float32)
    return m.reshape(9, h * w)


# ----------------------------------------------------------------------------
# In-kernel helpers
# ----------------------------------------------------------------------------
def _conv3x3_relu(x, masks_ref, w_ref, b_ref, w2, s):
    """3x3 'same' conv (BN scale pre-folded into weights) + bias + ReLU.

    x         : (Cin, S) f32, lane-dense flattened H2*W2 activation.
    masks_ref : (9, S) f32 {0,1} halo masks.
    w_ref     : (9, Cout, Cin) bf16, tap order k = ky*3 + kx.
    b_ref     : (Cout, 1) f32 folded BN bias.
    Shift-and-matmul: 9 lane rolls (XLU) + masks (VPU) + bf16 matmuls (MXU),
    accumulated in f32.  No im2col materialization, no scratch.
    """
    bf16 = jnp.bfloat16
    acc = None
    for ky in range(3):
        for kx in range(3):
            k = ky * 3 + kx
            d = (ky - 1) * w2 + (kx - 1)            # flat-index offset of this tap
            if d == 0:
                tap = x
            else:
                tap = pltpu.roll(x, shift=(-d) % s, axis=1)          # T[i] = X[i + d]
                tap = tap * masks_ref[pl.ds(k, 1), :]                # zero the halo
            p = jnp.dot(w_ref[k], tap.astype(bf16),
                        preferred_element_type=jnp.float32)          # (Cout, S)
            acc = p if acc is None else acc + p
    return jnp.maximum(acc + b_ref[...], 0.0)                        # (Cout, S) f32


def _up2d_fused_kernel(x1_ref, x2_ref, awt_ref, ah_ref, masks_ref,
                       w1_ref, b1_ref, w2_ref, b2_ref, o_ref,
                       *, C1, C2, H, W, H2, W2, MID, COUT,
                       pad_top, pad_bot, pad_left, pad_right):
    f32, bf16 = jnp.float32, jnp.bfloat16
    H2u, W2u = 2 * H, 2 * W
    S = H2 * W2

    # ---- 1) bilinear x2 upsample (align_corners=True) of x1, all channels at once --
    # Column interpolation: one lane-dense 2-D matmul.
    x1 = x1_ref[0].astype(bf16).reshape(C1 * H, W)
    t = jnp.dot(x1, awt_ref[...], preferred_element_type=f32)        # (C1*H, 2W)
    # Row interpolation: channel-batched matmul (no block-diagonal Kron operand).
    t3 = t.reshape(C1, H, W2u).astype(bf16)
    ah_b = jnp.broadcast_to(ah_ref[...], (C1, H2u, H))               # tiny bf16 operand
    up = jax.lax.dot_general(ah_b, t3,
                             dimension_numbers=(((2,), (1,)), ((0,), (0,))),
                             preferred_element_type=f32)             # (C1, 2H, 2W) f32

    # ---- 2) F.pad(up) to x2's spatial size (static; a no-op when sizes match) ------
    if pad_top or pad_bot:
        up = jnp.concatenate([jnp.zeros((C1, pad_top, W2u), f32), up,
                              jnp.zeros((C1, pad_bot, W2u), f32)], axis=1)
    if pad_left or pad_right:
        up = jnp.concatenate([jnp.zeros((C1, H2, pad_left), f32), up,
                              jnp.zeros((C1, H2, pad_right), f32)], axis=2)

    # ---- 3) channel concat [x2, x1_up], flattened lane-dense: (Cin, H2*W2) ---------
    x2f = x2_ref[0].astype(f32).reshape(C2, S)
    x = jnp.concatenate([x2f, up.reshape(C1, S)], axis=0)            # (C1+C2, S)

    # ---- 4) DoubleConv2D: (3x3 conv -> folded BN -> ReLU) * 2 ----------------------
    y1 = _conv3x3_relu(x, masks_ref, w1_ref, b1_ref, W2, S)          # (MID,  S)
    y2 = _conv3x3_relu(y1, masks_ref, w2_ref, b2_ref, W2, S)         # (COUT, S)

    # Lane-dense store: last dim H2*W2 (=256) is a multiple of 128.
    o_ref[0] = y2.astype(o_ref.dtype)


# ----------------------------------------------------------------------------
# Parameter init (deterministic, mirrors nn.Conv2d / nn.BatchNorm2d shapes).
# ----------------------------------------------------------------------------
def init_up2d_params(key, in_channels, out_channels):
    mid = in_channels // 2
    eps = 1e-5
    k_c1, k_b1, k_c2, k_b2 = jax.random.split(key, 4)

    def conv_init(k, cin, cout):
        kw, kb = jax.random.split(k)
        bound = 1.0 / jnp.sqrt(cin * 9.0)
        w = jax.random.uniform(kw, (3, 3, cin, cout), jnp.float32, -bound, bound)  # HWIO
        b = jax.random.uniform(kb, (cout,), jnp.float32, -bound, bound)
        return w, b

    def bn_init(k, c):
        k1, k2, k3, k4 = jax.random.split(k, 4)
        gamma = 1.0 + 0.1 * jax.random.normal(k1, (c,), jnp.float32)
        beta = 0.1 * jax.random.normal(k2, (c,), jnp.float32)
        mean = 0.1 * jax.random.normal(k3, (c,), jnp.float32)
        var = jax.random.uniform(k4, (c,), jnp.float32, 0.5, 1.5)
        return gamma, beta, mean, var

    w1, cb1 = conv_init(k_c1, in_channels, mid)
    g1, be1, m1, v1 = bn_init(k_b1, mid)
    w2, cb2 = conv_init(k_c2, mid, out_channels)
    g2, be2, m2, v2 = bn_init(k_b2, out_channels)

    s1 = g1 / jnp.sqrt(v1 + eps)
    b1 = (cb1 - m1) * s1 + be1
    s2 = g2 / jnp.sqrt(v2 + eps)
    b2 = (cb2 - m2) * s2 + be2
    return dict(w1=w1, s1=s1, b1=b1, w2=w2, s2=s2, b2=b2)


# ----------------------------------------------------------------------------
# Up2D.forward(x1, x2)   (bilinear=True path) -- single fused pallas_call
# ----------------------------------------------------------------------------
def up2d_forward(params, x1_nchw, x2_nchw):
    N, C1, H, W = x1_nchw.shape
    N2, C2, H2, W2 = x2_nchw.shape
    assert N == N2
    H2u, W2u = 2 * H, 2 * W
    diffY, diffX = H2 - H2u, W2 - W2u
    assert diffY >= 0 and diffX >= 0, "negative F.pad (crop) not supported"
    pad_top, pad_left = diffY // 2, diffX // 2
    pad_bot, pad_right = diffY - pad_top, diffX - pad_left
    S = H2 * W2

    w1, w2 = params["w1"], params["w2"]               # HWIO
    Cin, MID = w1.shape[2], w1.shape[3]
    COUT = w2.shape[3]
    assert Cin == C1 + C2 and w2.shape[2] == MID

    # Tiny trace-time constants (interp operators, halo masks) -- bf16 MXU operands.
    awt = jnp.asarray(_interp_matrix(W2u, W).T, jnp.bfloat16)          # (W, 2W)
    ah = jnp.asarray(_interp_matrix(H2u, H), jnp.bfloat16)             # (2H, H)
    masks = jnp.asarray(_tap_masks(H2, W2), jnp.float32)               # (9, S)

    # HWIO conv weights -> per-tap (Cout, Cin) matrices with BN scale folded in.
    w1t = (jnp.transpose(w1, (0, 1, 3, 2)) * params["s1"][None, None, :, None]
           ).reshape(9, MID, Cin).astype(jnp.bfloat16)
    w2t = (jnp.transpose(w2, (0, 1, 3, 2)) * params["s2"][None, None, :, None]
           ).reshape(9, COUT, MID).astype(jnp.bfloat16)
    b1 = params["b1"].reshape(MID, 1).astype(jnp.float32)
    b2 = params["b2"].reshape(COUT, 1).astype(jnp.float32)

    kern = functools.partial(
        _up2d_fused_kernel,
        C1=C1, C2=C2, H=H, W=W, H2=H2, W2=W2, MID=MID, COUT=COUT,
        pad_top=pad_top, pad_bot=pad_bot, pad_left=pad_left, pad_right=pad_right)

    out_flat = pl.pallas_call(
        kern,
        out_shape=jax.ShapeDtypeStruct((N, COUT, S), x2_nchw.dtype),
        grid=(N,),
        in_specs=[
            pl.BlockSpec((1, C1, H, W), lambda n: (n, 0, 0, 0)),       # x1 (deep)
            pl.BlockSpec((1, C2, H2, W2), lambda n: (n, 0, 0, 0)),     # x2 (skip)
            pl.BlockSpec((W, W2u), lambda n: (0, 0)),                  # col interp
            pl.BlockSpec((H2u, H), lambda n: (0, 0)),                  # row interp
            pl.BlockSpec((9, S), lambda n: (0, 0)),                    # halo masks
            pl.BlockSpec((9, MID, Cin), lambda n: (0, 0, 0)),          # conv1 taps (BN-scaled)
            pl.BlockSpec((MID, 1), lambda n: (0, 0)),                  # conv1 bias
            pl.BlockSpec((9, COUT, MID), lambda n: (0, 0, 0)),         # conv2 taps (BN-scaled)
            pl.BlockSpec((COUT, 1), lambda n: (0, 0)),                 # conv2 bias
        ],
        out_specs=pl.BlockSpec((1, COUT, S), lambda n: (n, 0, 0)),
        compiler_params=pltpu.CompilerParams(dimension_semantics=("parallel",)),
    )(x1_nchw, x2_nchw, awt, ah, masks, w1t, b1, w2t, b2)

    return out_flat.reshape(N, COUT, H2, W2)                           # NCHW (free reshape)


if __name__ == "__main__":
    in_channels, out_channels = 8, 4                   # Up2D(8, 4, bilinear=True)
    N, H, W = 2, 8, 8
    c1 = in_channels // 2                              # channels of x1 (deep feature)
    c2 = in_channels - c1                              # channels of x2 (skip feature)

    key = jax.random.PRNGKey(0)
    k_p, k_x1, k_x2 = jax.random.split(key, 3)
    params = init_up2d_params(k_p, in_channels, out_channels)

    x1 = jax.random.normal(k_x1, (N, c1, H, W), jnp.float32)           # (2, 4, 8, 8)
    x2 = jax.random.normal(k_x2, (N, c2, 2 * H, 2 * W), jnp.float32)   # (2, 4, 16, 16)

    fwd = jax.jit(up2d_forward)
    out = jax.block_until_ready(fwd(params, x1, x2))

    assert out.shape == (N, out_channels, 2 * H, 2 * W), out.shape
    assert bool(jnp.all(jnp.isfinite(out)))
    assert bool(jnp.all(out >= 0.0))                   # final ReLU
    print("KERNEL_OK")
</pallas_src>

<mosaic_0001>
module attributes {stable_mosaic.version = 11 : i64} {
  func.func @_up2d_fused_kernel(%arg0: i32, %arg1: memref<1x4x8x8xf32, #tpu.memory_space<vmem>>, %arg2: memref<1x4x16x16xf32, #tpu.memory_space<vmem>>, %arg3: memref<8x16xbf16, #tpu.memory_space<vmem>>, %arg4: memref<16x8xbf16, #tpu.memory_space<vmem>>, %arg5: memref<9x256xf32, #tpu.memory_space<vmem>>, %arg6: memref<9x4x8xbf16, #tpu.memory_space<vmem>>, %arg7: memref<4x1xf32, #tpu.memory_space<vmem>>, %arg8: memref<9x4x4xbf16, #tpu.memory_space<vmem>>, %arg9: memref<4x1xf32, #tpu.memory_space<vmem>>, %arg10: memref<1x4x256xf32, #tpu.memory_space<vmem>>) attributes {dimension_semantics = [#tpu.dimension_semantics<parallel>], iteration_bounds = array<i64: 2>, scalar_prefetch = 0 : i64, scratch_operands = 0 : i64, tpu.core_type = #tpu.core_type<tc>, window_params = [{transform_indices = @transform_0, window_bounds = array<i64: 1, 4, 8, 8>}, {transform_indices = @transform_1, window_bounds = array<i64: 1, 4, 16, 16>}, {pipeline_mode = #tpu.pipeline_mode<synchronous>, transform_indices = @transform_2, window_bounds = array<i64: 8, 16>}, {pipeline_mode = #tpu.pipeline_mode<synchronous>, transform_indices = @transform_3, window_bounds = array<i64: 16, 8>}, {pipeline_mode = #tpu.pipeline_mode<synchronous>, transform_indices = @transform_4, window_bounds = array<i64: 9, 256>}, {pipeline_mode = #tpu.pipeline_mode<synchronous>, transform_indices = @transform_5, window_bounds = array<i64: 9, 4, 8>}, {pipeline_mode = #tpu.pipeline_mode<synchronous>, transform_indices = @transform_6, window_bounds = array<i64: 4, 1>}, {pipeline_mode = #tpu.pipeline_mode<synchronous>, transform_indices = @transform_7, window_bounds = array<i64: 9, 4, 4>}, {pipeline_mode = #tpu.pipeline_mode<synchronous>, transform_indices = @transform_8, window_bounds = array<i64: 4, 1>}, {transform_indices = @transform_9, window_bounds = array<i64: 1, 4, 256>}]} {
    %c0 = arith.constant 0 : index
    %c0_0 = arith.constant 0 : index
    %c0_1 = arith.constant 0 : index
    %c0_2 = arith.constant 0 : index
    %0 = vector.load %arg1[%c0, %c0_0, %c0_1, %c0_2] : memref<1x4x8x8xf32, #tpu.memory_space<vmem>>, vector<1x4x8x8xf32>
    %1 = vector.shape_cast %0 : vector<1x4x8x8xf32> to vector<4x8x8xf32>
    %2 = arith.truncf %1 : vector<4x8x8xf32> to vector<4x8x8xbf16>
    %3 = vector.shape_cast %2 : vector<4x8x8xbf16> to vector<32x8xbf16>
    %c0_3 = arith.constant 0 : index
    %c0_4 = arith.constant 0 : index
    %4 = vector.load %arg3[%c0_3, %c0_4] : memref<8x16xbf16, #tpu.memory_space<vmem>>, vector<8x16xbf16>
    %cst = arith.constant dense<0.000000e+00> : vector<32x16xf32>
    %5 = tpu.matmul %3, %4, %cst {dimension_numbers = #tpu.dot_dimension_numbers<[1], [0], [0], [1], [0, 0, 1, 1], [], []>} : vector<32x8xbf16>, vector<8x16xbf16>, vector<32x16xf32> -> vector<32x16xf32>
    %6 = vector.shape_cast %5 : vector<32x16xf32> to vector<4x8x16xf32>
    %7 = arith.truncf %6 : vector<4x8x16xf32> to vector<4x8x16xbf16>
    %c0_5 = arith.constant 0 : index
    %c0_6 = arith.constant 0 : index
    %8 = vector.load %arg4[%c0_5, %c0_6] : memref<16x8xbf16, #tpu.memory_space<vmem>>, vector<16x8xbf16>
    %9 = vector.shape_cast %8 : vector<16x8xbf16> to vector<1x16x8xbf16>
    %10 = vector.broadcast %9 : vector<1x16x8xbf16> to vector<4x16x8xbf16>
    %cst_7 = arith.constant dense<0.000000e+00> : vector<4x16x16xf32>
    %11 = tpu.matmul %10, %7, %cst_7 {dimension_numbers = #tpu.dot_dimension_numbers<[2], [1], [1], [2], [0, 0, 0, 1, 1, 2], [0], [0]>} : vector<4x16x8xbf16>, vector<4x8x16xbf16>, vector<4x16x16xf32> -> vector<4x16x16xf32>
    %c0_8 = arith.constant 0 : index
    %c0_9 = arith.constant 0 : index
    %c0_10 = arith.constant 0 : index
    %c0_11 = arith.constant 0 : index
    %12 = vector.load %arg2[%c0_8, %c0_9, %c0_10, %c0_11] : memref<1x4x16x16xf32, #tpu.memory_space<vmem>>, vector<1x4x16x16xf32>
    %13 = vector.shape_cast %12 : vector<1x4x16x16xf32> to vector<4x16x16xf32>
    %14 = vector.shape_cast %13 : vector<4x16x16xf32> to vector<4x256xf32>
    %15 = vector.shape_cast %11 : vector<4x16x16xf32> to vector<4x256xf32>
    %16 = tpu.concatenate %14, %15 in 0 : vector<4x256xf32>, vector<4x256xf32> -> vector<8x256xf32>
    %c17_i32 = arith.constant 17 : i32
    %17 = tpu.dynamic_rotate %16 by %c17_i32 dim 1 : vector<8x256xf32>, i32 -> vector<8x256xf32>
    %c0_12 = arith.constant 0 : index
    %c0_13 = arith.constant 0 : index
    %18 = vector.load %arg5[%c0_12, %c0_13] : memref<9x256xf32, #tpu.memory_space<vmem>>, vector<1x256xf32>
    %19 = vector.broadcast %18 : vector<1x256xf32> to vector<8x256xf32>
    %20 = arith.mulf %17, %19 : vector<8x256xf32>
    %c0_14 = arith.constant 0 : index
    %c0_15 = arith.constant 0 : index
    %c0_16 = arith.constant 0 : index
    %21 = vector.load %arg6[%c0_14, %c0_15, %c0_16] : memref<9x4x8xbf16, #tpu.memory_space<vmem>>, vector<1x4x8xbf16>
    %22 = vector.shape_cast %21 : vector<1x4x8xbf16> to vector<4x8xbf16>
    %23 = arith.truncf %20 : vector<8x256xf32> to vector<8x256xbf16>
    %cst_17 = arith.constant dense<0.000000e+00> : vector<4x256xf32>
    %24 = tpu.matmul %22, %23, %cst_17 {dimension_numbers = #tpu.dot_dimension_numbers<[1], [0], [0], [1], [0, 0, 1, 1], [], []>} : vector<4x8xbf16>, vector<8x256xbf16>, vector<4x256xf32> -> vector<4x256xf32>
    %c16_i32 = arith.constant 16 : i32
    %25 = tpu.dynamic_rotate %16 by %c16_i32 dim 1 : vector<8x256xf32>, i32 -> vector<8x256xf32>
    %c1 = arith.constant 1 : index
    %c0_18 = arith.constant 0 : index
    %26 = vector.load %arg5[%c1, %c0_18] : memref<9x256xf32, #tpu.memory_space<vmem>>, vector<1x256xf32>
    %27 = vector.broadcast %26 : vector<1x256xf32> to vector<8x256xf32>
    %28 = arith.mulf %25, %27 : vector<8x256xf32>
    %c1_19 = arith.constant 1 : index
    %c0_20 = arith.constant 0 : index
    %c0_21 = arith.constant 0 : index
    %29 = vector.load %arg6[%c1_19, %c0_20, %c0_21] : memref<9x4x8xbf16, #tpu.memory_space<vmem>>, vector<1x4x8xbf16>
    %30 = vector.shape_cast %29 : vector<1x4x8xbf16> to vector<4x8xbf16>
    %31 = arith.truncf %28 : vector<8x256xf32> to vector<8x256xbf16>
    %cst_22 = arith.constant dense<0.000000e+00> : vector<4x256xf32>
    %32 = tpu.matmul %30, %31, %cst_22 {dimension_numbers = #tpu.dot_dimension_numbers<[1], [0], [0], [1], [0, 0, 1, 1], [], []>} : vector<4x8xbf16>, vector<8x256xbf16>, vector<4x256xf32> -> vector<4x256xf32>
    %33 = arith.addf %24, %32 : vector<4x256xf32>
    %c15_i32 = arith.constant 15 : i32
    %34 = tpu.dynamic_rotate %16 by %c15_i32 dim 1 : vector<8x256xf32>, i32 -> vector<8x256xf32>
    %c2 = arith.constant 2 : index
    %c0_23 = arith.constant 0 : index
    %35 = vector.load %arg5[%c2, %c0_23] : memref<9x256xf32, #tpu.memory_space<vmem>>, vector<1x256xf32>
    %36 = vector.broadcast %35 : vector<1x256xf32> to vector<8x256xf32>
    %37 = arith.mulf %34, %36 : vector<8x256xf32>
    %c2_24 = arith.constant 2 : index
    %c0_25 = arith.constant 0 : index
    %c0_26 = arith.constant 0 : index
    %38 = vector.load %arg6[%c2_24, %c0_25, %c0_26] : memref<9x4x8xbf16, #tpu.memory_space<vmem>>, vector<1x4x8xbf16>
    %39 = vector.shape_cast %38 : vector<1x4x8xbf16> to vector<4x8xbf16>
    %40 = arith.truncf %37 : vector<8x256xf32> to vector<8x256xbf16>
    %cst_27 = arith.constant dense<0.000000e+00> : vector<4x256xf32>
    %41 = tpu.matmul %39, %40, %cst_27 {dimension_numbers = #tpu.dot_dimension_numbers<[1], [0], [0], [1], [0, 0, 1, 1], [], []>} : vector<4x8xbf16>, vector<8x256xbf16>, vector<4x256xf32> -> vector<4x256xf32>
    %42 = arith.addf %33, %41 : vector<4x256xf32>
    %c1_i32 = arith.constant 1 : i32
    %43 = tpu.dynamic_rotate %16 by %c1_i32 dim 1 : vector<8x256xf32>, i32 -> vector<8x256xf32>
    %c3 = arith.constant 3 : index
    %c0_28 = arith.constant 0 : index
    %44 = vector.load %arg5[%c3, %c0_28] : memref<9x256xf32, #tpu.memory_space<vmem>>, vector<1x256xf32>
    %45 = vector.broadcast %44 : vector<1x256xf32> to vector<8x256xf32>
    %46 = arith.mulf %43, %45 : vector<8x256xf32>
    %c3_29 = arith.constant 3 : index
    %c0_30 = arith.constant 0 : index
    %c0_31 = arith.constant 0 : index
    %47 = vector.load %arg6[%c3_29, %c0_30, %c0_31] : memref<9x4x8xbf16, #tpu.memory_space<vmem>>, vector<1x4x8xbf16>
    %48 = vector.shape_cast %47 : vector<1x4x8xbf16> to vector<4x8xbf16>
    %49 = arith.truncf %46 : vector<8x256xf32> to vector<8x256xbf16>
    %cst_32 = arith.constant dense<0.000000e+00> : vector<4x256xf32>
    %50 = tpu.matmul %48, %49, %cst_32 {dimension_numbers = #tpu.dot_dimension_numbers<[1], [0], [0], [1], [0, 0, 1, 1], [], []>} : vector<4x8xbf16>, vector<8x256xbf16>, vector<4x256xf32> -> vector<4x256xf32>
    %51 = arith.addf %42, %50 : vector<4x256xf32>
    %c4 = arith.constant 4 : index
    %c0_33 = arith.constant 0 : index
    %c0_34 = arith.constant 0 : index
    %52 = vector.load %arg6[%c4, %c0_33, %c0_34] : memref<9x4x8xbf16, #tpu.memory_space<vmem>>, vector<1x4x8xbf16>
    %53 = vector.shape_cast %52 : vector<1x4x8xbf16> to vector<4x8xbf16>
    %54 = arith.truncf %16 : vector<8x256xf32> to vector<8x256xbf16>
    %cst_35 = arith.constant dense<0.000000e+00> : vector<4x256xf32>
    %55 = tpu.matmul %53, %54, %cst_35 {dimension_numbers = #tpu.dot_dimension_numbers<[1], [0], [0], [1], [0, 0, 1, 1], [], []>} : vector<4x8xbf16>, vector<8x256xbf16>, vector<4x256xf32> -> vector<4x256xf32>
    %56 = arith.addf %51, %55 : vector<4x256xf32>
    %c255_i32 = arith.constant 255 : i32
    %57 = tpu.dynamic_rotate %16 by %c255_i32 dim 1 : vector<8x256xf32>, i32 -> vector<8x256xf32>
    %c5 = arith.constant 5 : index
    %c0_36 = arith.constant 0 : index
    %58 = vector.load %arg5[%c5, %c0_36] : memref<9x256xf32, #tpu.memory_space<vmem>>, vector<1x256xf32>
    %59 = vector.broadcast %58 : vector<1x256xf32> to vector<8x256xf32>
    %60 = arith.mulf %57, %59 : vector<8x256xf32>
    %c5_37 = arith.constant 5 : index
    %c0_38 = arith.constant 0 : index
    %c0_39 = arith.constant 0 : index
    %61 = vector.load %arg6[%c5_37, %c0_38, %c0_39] : memref<9x4x8xbf16, #tpu.memory_space<vmem>>, vector<1x4x8xbf16>
    %62 = vector.shape_cast %61 : vector<1x4x8xbf16> to vector<4x8xbf16>
    %63 = arith.truncf %60 : vector<8x256xf32> to vector<8x256xbf16>
    %cst_40 = arith.constant dense<0.000000e+00> : vector<4x256xf32>
    %64 = tpu.matmul %62, %63, %cst_40 {dimension_numbers = #tpu.dot_dimension_numbers<[1], [0], [0], [1], [0, 0, 1, 1], [], []>} : vector<4x8xbf16>, vector<8x256xbf16>, vector<4x256xf32> -> vector<4x256xf32>
    %65 = arith.addf %56, %64 : vector<4x256xf32>
    %c241_i32 = arith.constant 241 : i32
    %66 = tpu.dynamic_rotate %16 by %c241_i32 dim 1 : vector<8x256xf32>, i32 -> vector<8x256xf32>
    %c6 = arith.constant 6 : index
    %c0_41 = arith.constant 0 : index
    %67 = vector.load %arg5[%c6, %c0_41] : memref<9x256xf32, #tpu.memory_space<vmem>>, vector<1x256xf32>
    %68 = vector.broadcast %67 : vector<1x256xf32> to vector<8x256xf32>
    %69 = arith.mulf %66, %68 : vector<8x256xf32>
    %c6_42 = arith.constant 6 : index
    %c0_43 = arith.constant 0 : index
    %c0_44 = arith.constant 0 : index
    %70 = vector.load %arg6[%c6_42, %c0_43, %c0_44] : memref<9x4x8xbf16, #tpu.memory_space<vmem>>, vector<1x4x8xbf16>
    %71 = vector.shape_cast %70 : vector<1x4x8xbf16> to vector<4x8xbf16>
    %72 = arith.truncf %69 : vector<8x256xf32> to vector<8x256xbf16>
    %cst_45 = arith.constant dense<0.000000e+00> : vector<4x256xf32>
    %73 = tpu.matmul %71, %72, %cst_45 {dimension_numbers = #tpu.dot_dimension_numbers<[1], [0], [0], [1], [0, 0, 1, 1], [], []>} : vector<4x8xbf16>, vector<8x256xbf16>, vector<4x256xf32> -> vector<4x256xf32>
    %74 = arith.addf %65, %73 : vector<4x256xf32>
    %c240_i32 = arith.constant 240 : i32
    %75 = tpu.dynamic_rotate %16 by %c240_i32 dim 1 : vector<8x256xf32>, i32 -> vector<8x256xf32>
    %c7 = arith.constant 7 : index
    %c0_46 = arith.constant 0 : index
    %76 = vector.load %arg5[%c7, %c0_46] : memref<9x256xf32, #tpu.memory_space<vmem>>, vector<1x256xf32>
    %77 = vector.broadcast %76 : vector<1x256xf32> to vector<8x256xf32>
    %78 = arith.mulf %75, %77 : vector<8x256xf32>
    %c7_47 = arith.constant 7 : index
    %c0_48 = arith.constant 0 : index
    %c0_49 = arith.constant 0 : index
    %79 = vector.load %arg6[%c7_47, %c0_48, %c0_49] : memref<9x4x8xbf16, #tpu.memory_space<vmem>>, vector<1x4x8xbf16>
    %80 = vector.shape_cast %79 : vector<1x4x8xbf16> to vector<4x8xbf16>
    %81 = arith.truncf %78 : vector<8x256xf32> to vector<8x256xbf16>
    %cst_50 = arith.constant dense<0.000000e+00> : vector<4x256xf32>
    %82 = tpu.matmul %80, %81, %cst_50 {dimension_numbers = #tpu.dot_dimension_numbers<[1], [0], [0], [1], [0, 0, 1, 1], [], []>} : vector<4x8xbf16>, vector<8x256xbf16>, vector<4x256xf32> -> vector<4x256xf32>
    %83 = arith.addf %74, %82 : vector<4x256xf32>
    %c239_i32 = arith.constant 239 : i32
    %84 = tpu.dynamic_rotate %16 by %c239_i32 dim 1 : vector<8x256xf32>, i32 -> vector<8x256xf32>
    %c8 = arith.constant 8 : index
    %c0_51 = arith.constant 0 : index
    %85 = vector.load %arg5[%c8, %c0_51] : memref<9x256xf32, #tpu.memory_space<vmem>>, vector<1x256xf32>
    %86 = vector.broadcast %85 : vector<1x256xf32> to vector<8x256xf32>
    %87 = arith.mulf %84, %86 : vector<8x256xf32>
    %c8_52 = arith.constant 8 : index
    %c0_53 = arith.constant 0 : index
    %c0_54 = arith.constant 0 : index
    %88 = vector.load %arg6[%c8_52, %c0_53, %c0_54] : memref<9x4x8xbf16, #tpu.memory_space<vmem>>, vector<1x4x8xbf16>
    %89 = vector.shape_cast %88 : vector<1x4x8xbf16> to vector<4x8xbf16>
    %90 = arith.truncf %87 : vector<8x256xf32> to vector<8x256xbf16>
    %cst_55 = arith.constant dense<0.000000e+00> : vector<4x256xf32>
    %91 = tpu.matmul %89, %90, %cst_55 {dimension_numbers = #tpu.dot_dimension_numbers<[1], [0], [0], [1], [0, 0, 1, 1], [], []>} : vector<4x8xbf16>, vector<8x256xbf16>, vector<4x256xf32> -> vector<4x256xf32>
    %92 = arith.addf %83, %91 : vector<4x256xf32>
    %c0_56 = arith.constant 0 : index
    %c0_57 = arith.constant 0 : index
    %93 = vector.load %arg7[%c0_56, %c0_57] : memref<4x1xf32, #tpu.memory_space<vmem>>, vector<4x1xf32>
    %94 = vector.broadcast %93 : vector<4x1xf32> to vector<4x256xf32>
    %95 = arith.addf %92, %94 : vector<4x256xf32>
    %cst_58 = arith.constant 0.000000e+00 : f32
    %96 = vector.broadcast %cst_58 : f32 to vector<4x256xf32>
    %97 = arith.maximumf %95, %96 : vector<4x256xf32>
    %c17_i32_59 = arith.constant 17 : i32
    %98 = tpu.dynamic_rotate %97 by %c17_i32_59 dim 1 : vector<4x256xf32>, i32 -> vector<4x256xf32>
    %c0_60 = arith.constant 0 : index
    %c0_61 = arith.constant 0 : index
    %99 = vector.load %arg5[%c0_60, %c0_61] : memref<9x256xf32, #tpu.memory_space<vmem>>, vector<1x256xf32>
    %100 = vector.broadcast %99 : vector<1x256xf32> to vector<4x256xf32>
    %101 = arith.mulf %98, %100 : vector<4x256xf32>
    %c0_62 = arith.constant 0 : index
    %c0_63 = arith.constant 0 : index
    %c0_64 = arith.constant 0 : index
    %102 = vector.load %arg8[%c0_62, %c0_63, %c0_64] : memref<9x4x4xbf16, #tpu.memory_space<vmem>>, vector<1x4x4xbf16>
    %103 = vector.shape_cast %102 : vector<1x4x4xbf16> to vector<4x4xbf16>
    %104 = arith.truncf %101 : vector<4x256xf32> to vector<4x256xbf16>
    %cst_65 = arith.constant dense<0.000000e+00> : vector<4x256xf32>
    %105 = tpu.matmul %103, %104, %cst_65 {dimension_numbers = #tpu.dot_dimension_numbers<[1], [0], [0], [1], [0, 0, 1, 1], [], []>} : vector<4x4xbf16>, vector<4x256xbf16>, vector<4x256xf32> -> vector<4x256xf32>
    %c16_i32_66 = arith.constant 16 : i32
    %106 = tpu.dynamic_rotate %97 by %c16_i32_66 dim 1 : vector<4x256xf32>, i32 -> vector<4x256xf32>
    %c1_67 = arith.constant 1 : index
    %c0_68 = arith.constant 0 : index
    %107 = vector.load %arg5[%c1_67, %c0_68] : memref<9x256xf32, #tpu.memory_space<vmem>>, vector<1x256xf32>
    %108 = vector.broadcast %107 : vector<1x256xf32> to vector<4x256xf32>
    %109 = arith.mulf %106, %108 : vector<4x256xf32>
    %c1_69 = arith.constant 1 : index
    %c0_70 = arith.constant 0 : index
    %c0_71 = arith.constant 0 : index
    %110 = vector.load %arg8[%c1_69, %c0_70, %c0_71] : memref<9x4x4xbf16, #tpu.memory_space<vmem>>, vector<1x4x4xbf16>
    %111 = vector.shape_cast %110 : vector<1x4x4xbf16> to vector<4x4xbf16>
    %112 = arith.truncf %109 : vector<4x256xf32> to vector<4x256xbf16>
    %cst_72 = arith.constant dense<0.000000e+00> : vector<4x256xf32>
    %113 = tpu.matmul %111, %112, %cst_72 {dimension_numbers = #tpu.dot_dimension_numbers<[1], [0], [0], [1], [0, 0, 1, 1], [], []>} : vector<4x4xbf16>, vector<4x256xbf16>, vector<4x256xf32> -> vector<4x256xf32>
    %114 = arith.addf %105, %113 : vector<4x256xf32>
    %c15_i32_73 = arith.constant 15 : i32
    %115 = tpu.dynamic_rotate %97 by %c15_i32_73 dim 1 : vector<4x256xf32>, i32 -> vector<4x256xf32>
    %c2_74 = arith.constant 2 : index
    %c0_75 = arith.constant 0 : index
    %116 = vector.load %arg5[%c2_74, %c0_75] : memref<9x256xf32, #tpu.memory_space<vmem>>, vector<1x256xf32>
    %117 = vector.broadcast %116 : vector<1x256xf32> to vector<4x256xf32>
    %118 = arith.mulf %115, %117 : vector<4x256xf32>
    %c2_76 = arith.constant 2 : index
    %c0_77 = arith.constant 0 : index
    %c0_78 = arith.constant 0 : index
    %119 = vector.load %arg8[%c2_76, %c0_77, %c0_78] : memref<9x4x4xbf16, #tpu.memory_space<vmem>>, vector<1x4x4xbf16>
    %120 = vector.shape_cast %119 : vector<1x4x4xbf16> to vector<4x4xbf16>
    %121 = arith.truncf %118 : vector<4x256xf32> to vector<4x256xbf16>
    %cst_79 = arith.constant dense<0.000000e+00> : vector<4x256xf32>
    %122 = tpu.matmul %120, %121, %cst_79 {dimension_numbers = #tpu.dot_dimension_numbers<[1], [0], [0], [1], [0, 0, 1, 1], [], []>} : vector<4x4xbf16>, vector<4x256xbf16>, vector<4x256xf32> -> vector<4x256xf32>
    %123 = arith.addf %114, %122 : vector<4x256xf32>
    %c1_i32_80 = arith.constant 1 : i32
    %124 = tpu.dynamic_rotate %97 by %c1_i32_80 dim 1 : vector<4x256xf32>, i32 -> vector<4x256xf32>
    %c3_81 = arith.constant 3 : index
    %c0_82 = arith.constant 0 : index
    %125 = vector.load %arg5[%c3_81, %c0_82] : memref<9x256xf32, #tpu.memory_space<vmem>>, vector<1x256xf32>
    %126 = vector.broadcast %125 : vector<1x256xf32> to vector<4x256xf32>
    %127 = arith.mulf %124, %126 : vector<4x256xf32>
    %c3_83 = arith.constant 3 : index
    %c0_84 = arith.constant 0 : index
    %c0_85 = arith.constant 0 : index
    %128 = vector.load %arg8[%c3_83, %c0_84, %c0_85] : memref<9x4x4xbf16, #tpu.memory_space<vmem>>, vector<1x4x4xbf16>
    %129 = vector.shape_cast %128 : vector<1x4x4xbf16> to vector<4x4xbf16>
    %130 = arith.truncf %127 : vector<4x256xf32> to vector<4x256xbf16>
    %cst_86 = arith.constant dense<0.000000e+00> : vector<4x256xf32>
    %131 = tpu.matmul %129, %130, %cst_86 {dimension_numbers = #tpu.dot_dimension_numbers<[1], [0], [0], [1], [0, 0, 1, 1], [], []>} : vector<4x4xbf16>, vector<4x256xbf16>, vector<4x256xf32> -> vector<4x256xf32>
    %132 = arith.addf %123, %131 : vector<4x256xf32>
    %c4_87 = arith.constant 4 : index
    %c0_88 = arith.constant 0 : index
    %c0_89 = arith.constant 0 : index
    %133 = vector.load %arg8[%c4_87, %c0_88, %c0_89] : memref<9x4x4xbf16, #tpu.memory_space<vmem>>, vector<1x4x4xbf16>
    %134 = vector.shape_cast %133 : vector<1x4x4xbf16> to vector<4x4xbf16>
    %135 = arith.truncf %97 : vector<4x256xf32> to vector<4x256xbf16>
    %cst_90 = arith.constant dense<0.000000e+00> : vector<4x256xf32>
    %136 = tpu.matmul %134, %135, %cst_90 {dimension_numbers = #tpu.dot_dimension_numbers<[1], [0], [0], [1], [0, 0, 1, 1], [], []>} : vector<4x4xbf16>, vector<4x256xbf16>, vector<4x256xf32> -> vector<4x256xf32>
    %137 = arith.addf %132, %136 : vector<4x256xf32>
    %c255_i32_91 = arith.constant 255 : i32
    %138 = tpu.dynamic_rotate %97 by %c255_i32_91 dim 1 : vector<4x256xf32>, i32 -> vector<4x256xf32>
    %c5_92 = arith.constant 5 : index
    %c0_93 = arith.constant 0 : index
    %139 = vector.load %arg5[%c5_92, %c0_93] : memref<9x256xf32, #tpu.memory_space<vmem>>, vector<1x256xf32>
    %140 = vector.broadcast %139 : vector<1x256xf32> to vector<4x256xf32>
    %141 = arith.mulf %138, %140 : vector<4x256xf32>
    %c5_94 = arith.constant 5 : index
    %c0_95 = arith.constant 0 : index
    %c0_96 = arith.constant 0 : index
    %142 = vector.load %arg8[%c5_94, %c0_95, %c0_96] : memref<9x4x4xbf16, #tpu.memory_space<vmem>>, vector<1x4x4xbf16>
    %143 = vector.shape_cast %142 : vector<1x4x4xbf16> to vector<4x4xbf16>
    %144 = arith.truncf %141 : vector<4x256xf32> to vector<4x256xbf16>
    %cst_97 = arith.constant dense<0.000000e+00> : vector<4x256xf32>
    %145 = tpu.matmul %143, %144, %cst_97 {dimension_numbers = #tpu.dot_dimension_numbers<[1], [0], [0], [1], [0, 0, 1, 1], [], []>} : vector<4x4xbf16>, vector<4x256xbf16>, vector<4x256xf32> -> vector<4x256xf32>
    %146 = arith.addf %137, %145 : vector<4x256xf32>
    %c241_i32_98 = arith.constant 241 : i32
    %147 = tpu.dynamic_rotate %97 by %c241_i32_98 dim 1 : vector<4x256xf32>, i32 -> vector<4x256xf32>
    %c6_99 = arith.constant 6 : index
    %c0_100 = arith.constant 0 : index
    %148 = vector.load %arg5[%c6_99, %c0_100] : memref<9x256xf32, #tpu.memory_space<vmem>>, vector<1x256xf32>
    %149 = vector.broadcast %148 : vector<1x256xf32> to vector<4x256xf32>
    %150 = arith.mulf %147, %149 : vector<4x256xf32>
    %c6_101 = arith.constant 6 : index
    %c0_102 = arith.constant 0 : index
    %c0_103 = arith.constant 0 : index
    %151 = vector.load %arg8[%c6_101, %c0_102, %c0_103] : memref<9x4x4xbf16, #tpu.memory_space<vmem>>, vector<1x4x4xbf16>
    %152 = vector.shape_cast %151 : vector<1x4x4xbf16> to vector<4x4xbf16>
    %153 = arith.truncf %150 : vector<4x256xf32> to vector<4x256xbf16>
    %cst_104 = arith.constant dense<0.000000e+00> : vector<4x256xf32>
    %154 = tpu.matmul %152, %153, %cst_104 {dimension_numbers = #tpu.dot_dimension_numbers<[1], [0], [0], [1], [0, 0, 1, 1], [], []>} : vector<4x4xbf16>, vector<4x256xbf16>, vector<4x256xf32> -> vector<4x256xf32>
    %155 = arith.addf %146, %154 : vector<4x256xf32>
    %c240_i32_105 = arith.constant 240 : i32
    %156 = tpu.dynamic_rotate %97 by %c240_i32_105 dim 1 : vector<4x256xf32>, i32 -> vector<4x256xf32>
    %c7_106 = arith.constant 7 : index
    %c0_107 = arith.constant 0 : index
    %157 = vector.load %arg5[%c7_106, %c0_107] : memref<9x256xf32, #tpu.memory_space<vmem>>, vector<1x256xf32>
    %158 = vector.broadcast %157 : vector<1x256xf32> to vector<4x256xf32>
    %159 = arith.mulf %156, %158 : vector<4x256xf32>
    %c7_108 = arith.constant 7 : index
    %c0_109 = arith.constant 0 : index
    %c0_110 = arith.constant 0 : index
    %160 = vector.load %arg8[%c7_108, %c0_109, %c0_110] : memref<9x4x4xbf16, #tpu.memory_space<vmem>>, vector<1x4x4xbf16>
    %161 = vector.shape_cast %160 : vector<1x4x4xbf16> to vector<4x4xbf16>
    %162 = arith.truncf %159 : vector<4x256xf32> to vector<4x256xbf16>
    %cst_111 = arith.constant dense<0.000000e+00> : vector<4x256xf32>
    %163 = tpu.matmul %161, %162, %cst_111 {dimension_numbers = #tpu.dot_dimension_numbers<[1], [0], [0], [1], [0, 0, 1, 1], [], []>} : vector<4x4xbf16>, vector<4x256xbf16>, vector<4x256xf32> -> vector<4x256xf32>
    %164 = arith.addf %155, %163 : vector<4x256xf32>
    %c239_i32_112 = arith.constant 239 : i32
    %165 = tpu.dynamic_rotate %97 by %c239_i32_112 dim 1 : vector<4x256xf32>, i32 -> vector<4x256xf32>
    %c8_113 = arith.constant 8 : index
    %c0_114 = arith.constant 0 : index
    %166 = vector.load %arg5[%c8_113, %c0_114] : memref<9x256xf32, #tpu.memory_space<vmem>>, vector<1x256xf32>
    %167 = vector.broadcast %166 : vector<1x256xf32> to vector<4x256xf32>
    %168 = arith.mulf %165, %167 : vector<4x256xf32>
    %c8_115 = arith.constant 8 : index
    %c0_116 = arith.constant 0 : index
    %c0_117 = arith.constant 0 : index
    %169 = vector.load %arg8[%c8_115, %c0_116, %c0_117] : memref<9x4x4xbf16, #tpu.memory_space<vmem>>, vector<1x4x4xbf16>
    %170 = vector.shape_cast %169 : vector<1x4x4xbf16> to vector<4x4xbf16>
    %171 = arith.truncf %168 : vector<4x256xf32> to vector<4x256xbf16>
    %cst_118 = arith.constant dense<0.000000e+00> : vector<4x256xf32>
    %172 = tpu.matmul %170, %171, %cst_118 {dimension_numbers = #tpu.dot_dimension_numbers<[1], [0], [0], [1], [0, 0, 1, 1], [], []>} : vector<4x4xbf16>, vector<4x256xbf16>, vector<4x256xf32> -> vector<4x256xf32>
    %173 = arith.addf %164, %172 : vector<4x256xf32>
    %c0_119 = arith.constant 0 : index
    %c0_120 = arith.constant 0 : index
    %174 = vector.load %arg9[%c0_119, %c0_120] : memref<4x1xf32, #tpu.memory_space<vmem>>, vector<4x1xf32>
    %175 = vector.broadcast %174 : vector<4x1xf32> to vector<4x256xf32>
    %176 = arith.addf %173, %175 : vector<4x256xf32>
    %cst_121 = arith.constant 0.000000e+00 : f32
    %177 = vector.broadcast %cst_121 : f32 to vector<4x256xf32>
    %178 = arith.maximumf %176, %177 : vector<4x256xf32>
    %c0_122 = arith.constant 0 : index
    %c0_123 = arith.constant 0 : index
    %c0_124 = arith.constant 0 : index
    %179 = vector.load %arg10[%c0_122, %c0_123, %c0_124] : memref<1x4x256xf32, #tpu.memory_space<vmem>>, vector<1x4x256xf32>
    %180 = vector.shape_cast %179 : vector<1x4x256xf32> to vector<4x256xf32>
    %181 = vector.shape_cast %178 : vector<4x256xf32> to vector<1x4x256xf32>
    tpu.vector_store %arg10[%c0_122, %c0_123, %c0_124], %181 {strides = array<i32>} : memref<1x4x256xf32, #tpu.memory_space<vmem>>, vector<1x4x256xf32>,
    return
  }
  func.func @transform_0(%arg0: i32) -> (i32, i32, i32, i32) {
    %c0_i32 = arith.constant 0 : i32
    %c0_i32_0 = arith.constant 0 : i32
    %c0_i32_1 = arith.constant 0 : i32
    %c0_i32_2 = arith.constant 0 : i32
    return %arg0, %c0_i32, %c0_i32_0, %c0_i32_1 : i32, i32, i32, i32
  }
  func.func @transform_1(%arg0: i32) -> (i32, i32, i32, i32) {
    %c0_i32 = arith.constant 0 : i32
    %c0_i32_0 = arith.constant 0 : i32
    %c0_i32_1 = arith.constant 0 : i32
    %c0_i32_2 = arith.constant 0 : i32
    return %arg0, %c0_i32, %c0_i32_0, %c0_i32_1 : i32, i32, i32, i32
  }
  func.func @transform_2(%arg0: i32) -> (i32, i32) {
    %c0_i32 = arith.constant 0 : i32
    %c0_i32_0 = arith.constant 0 : i32
    %c0_i32_1 = arith.constant 0 : i32
    return %c0_i32, %c0_i32_0 : i32, i32
  }
  func.func @transform_3(%arg0: i32) -> (i32, i32) {
    %c0_i32 = arith.constant 0 : i32
    %c0_i32_0 = arith.constant 0 : i32
    %c0_i32_1 = arith.constant 0 : i32
    return %c0_i32, %c0_i32_0 : i32, i32
  }
  func.func @transform_4(%arg0: i32) -> (i32, i32) {
    %c0_i32 = arith.constant 0 : i32
    %c0_i32_0 = arith.constant 0 : i32
    %c0_i32_1 = arith.constant 0 : i32
    return %c0_i32, %c0_i32_0 : i32, i32
  }
  func.func @transform_5(%arg0: i32) -> (i32, i32, i32) {
    %c0_i32 = arith.constant 0 : i32
    %c0_i32_0 = arith.constant 0 : i32
    %c0_i32_1 = arith.constant 0 : i32
    %c0_i32_2 = arith.constant 0 : i32
    return %c0_i32, %c0_i32_0, %c0_i32_1 : i32, i32, i32
  }
  func.func @transform_6(%arg0: i32) -> (i32, i32) {
    %c0_i32 = arith.constant 0 : i32
    %c0_i32_0 = arith.constant 0 : i32
    %c0_i32_1 = arith.constant 0 : i32
    return %c0_i32, %c0_i32_0 : i32, i32
  }
  func.func @transform_7(%arg0: i32) -> (i32, i32, i32) {
    %c0_i32 = arith.constant 0 : i32
    %c0_i32_0 = arith.constant 0 : i32
    %c0_i32_1 = arith.constant 0 : i32
    %c0_i32_2 = arith.constant 0 : i32
    return %c0_i32, %c0_i32_0, %c0_i32_1 : i32, i32, i32
  }
  func.func @transform_8(%arg0: i32) -> (i32, i32) {
    %c0_i32 = arith.constant 0 : i32
    %c0_i32_0 = arith.constant 0 : i32
    %c0_i32_1 = arith.constant 0 : i32
    return %c0_i32, %c0_i32_0 : i32, i32
  }
  func.func @transform_9(%arg0: i32) -> (i32, i32, i32) {
    %c0_i32 = arith.constant 0 : i32
    %c0_i32_0 = arith.constant 0 : i32
    %c0_i32_1 = arith.constant 0 : i32
    return %arg0, %c0_i32, %c0_i32_0 : i32, i32, i32
  }
}

</mosaic_0001>

<bundles_post_ra>
// kernel: up2d_forward.1
= control target key start
LH: loop header
LB: loop body
LE: loop exit
PB: predicated region body
PF: predicated region fallthrough
CT: control target
= control target key end

     0   :  { %14 = vsyncpa [#allocation3], 0  ;;  %s2693_s30 = smov 0   ;;  %s3300_s0 = inlined_call_operand.vmem [shape: f32[2,4,8,8], index: 0, kind: input, shape index: {}]   ;;  %s3301_s1 = inlined_call_operand.vmem [shape: f32[2,4,16,16], index: 1, kind: input, shape index: {}]   ;;  %s3302_s2 = inlined_call_operand.vmem [shape: bf16[8,16], index: 2, kind: input, shape index: {}]   ;;  %s3303_s3 = inlined_call_operand.vmem [shape: bf16[16,8], index: 3, kind: input, shape index: {}]   ;;  %s3304_s4 = inlined_call_operand.hbm [shape: f32[9,256], index: 4, kind: input, shape index: {}]   ;;  %s3305_s5 = inlined_call_operand.vmem [shape: bf16[9,4,8], index: 5, kind: input, shape index: {}]   ;;  %s3306_s6 = inlined_call_operand.vmem [shape: f32[4,1], index: 6, kind: input, shape index: {}]   ;;  %s3307_s7 = inlined_call_operand.vmem [shape: bf16[9,4,4], index: 7, kind: input, shape index: {}]   ;;  %s3308_s8 = inlined_call_operand.vmem [shape: f32[4,1], index: 8, kind: input, shape index: {}]   ;;  %s3309_s9 = inlined_call_operand.vmem [shape: f32[2,4,256], index: 9, kind: output, shape index: {}]  }
   0x1 LB: > { %s2699_s10 = sadd.s32 4294967295, %s2620_s30   ;;  %p2420_p0 = scmp.ge.s32.totalorder %s2620_s30, 1  ;;  %s2620_s30 = sphi %s2693_s30, %s20_s30  }
   0x2   : > { %p250_p1 = scmp.lt.s32.totalorder %s2620_s30, 3  ;;  %s2622_s11 = smov [#allocation2]  }
   0x3   : > { %s268_s12 = sshll.u32 %s2622_s11, 4  ;;  %p3310_p3 = scmp.eq.s32.totalorder %s2699_s10, 0  ;;  %s269_s12 = int_to_ptr.vmem [resolvable:$true] %s268_s12 }
   0x4   : > { %p2703_p2 = pnand %p2420_p0, %p250_p1  ;;  %s2582_s17 = scalar_lea.hbm %s3304_s4, 512 }
   0x5   : > { %p2583_p6 = scmp.ne.s32.totalorder %s3304_s4, %s2582_s17  ;;  %p2589_p10 = scmp.lt.u32.totalorder %s2582_s17, %s3304_s4 }
   0x6   : > { %s3312_s13 = scalar_select %p2703_p2, 1, 0 }
   0x7   : > { %p2545_p4 = pneg %p2703_p2 }
   0x9   : > { %p2712_p5 = pnand %p3310_p3, %p2545_p4 }
   0xb   : > { %p2584_p7 = pneg %p2712_p5 }
   0xd   : > { %p2585_p8 = pnand %p2584_p7, %p2583_p6 }
   0xf   : > { %p2586_p9 = pneg %p2585_p8 }
  0x11   : > { %p2591_p11 = pnand %p2589_p10, %p2586_p9 }
  0x13   : > { %2594 = shalt.err (!%p2591_p11)
}
  0x14   : > { %s2595_s22 = scalar_lea.vmem %s269_s12, 512  ;;  %p2603_p1 = scmp.lt.s32.totalorder %s269_s12, %s269_s12 }
  0x15   : > { %p2596_p12 = scmp.ne.s32.totalorder %s269_s12, %s2595_s22  ;;  %p2604_p4 = scmp.lt.s32.totalorder %s2595_s22, %s2595_s22 }
  0x17   : > { %p2598_p13 = pnand %p2596_p12, %p2584_p7  ;;  %p2605_p3 = por %p2604_p4, %p2603_p1 }
  0x19   : > { %p2599_p0 = pneg %p2598_p13 }
  0x1b   : > { %p2606_p2 = pnand %p2605_p3, %p2599_p0 }
  0x1d   : > { %2609 = shalt.err (!%p2606_p2)
}
  0x1e   : > { %s2623_s23 = smov 256   ;;  %s2624_s24 = smov 16  }
  0x1f   : > { %2548 = dma.hbm_to_vmem [thread:$0]  (!%p2712_p5), %s3304_s4, 512, %s269_s12, [#allocation3], %s2623_s23, %s2623_s23, %s2624_s24  }
  0x20   : > { %p3314_p6 = scmp.ne.s32.totalorder %s3312_s13, 0 }
  0x21   : > { %p3315_p8 = scmp.eq.s32.totalorder (!%p3314_p6), %s2699_s10, 0 }
  0x22   : > { %312 = sbr.rel (%p3314_p6) target bundleno = 1406 (0x57e), region = 56 }
  0x29   : > { %2615 = dma.done.wait (%p3315_p8), [#allocation3], 512   ;;  %p3316_p7 = pmov %p3315_p8 }
  0x2a   : > { %p353_p2 = scmp.lt.s32.totalorder %s2699_s10, 1  ;;  %vm395_vm0 = vcmask 1043456   ;;  %v377_v0 = vld [vmem:[%s3302_s2] sm:$0xf]  ;;  %vm388_vm1 = vcmask 64512   ;;  %v2625_v8 = vmov 0.0   ;;  %v651_v12 = vlaneseq }
  0x2b   : > { %2617 = vsyncadd (%p3316_p7), [#allocation3], 4294966784  ;;  %2540 = vmatprep.subr.msk.bf16.mxu0 %vm395_vm0, %v377_v0  ;;  %v397_v3 = vsel %vm395_vm0, %v377_v0, 0  ;;  %2516 = vmatprep.subr.bf16.mxu1 %v2625_v8  ;;  %vm2626_vm2 = vmmov 0   ;;  %v2627_v14 = vmov 1983009808  }
  0x2c   : > { %s3318_s10 = smov (!%p353_p2, %s2699_s10), 1  ;;  %2511 = vmatpush3.bf16.msra.mxu0 %v397_v3  ;;  %2518 = vmatprep.mubr.msk.bf16.mxu1 %vm2626_vm2, %v2625_v8  ;;  %v649_v15 = vunpack.c.l.s4 %v2627_v14  ;;  %v2764_v18 = vshrl.u32 %v651_v12, 7  ;;  %v2628_v19 = vmov 1934713408   ;;  %s2629_s18 = smov 32   ;;  %v2581_v3 = vld [vmem:[%s3303_s3] sm:$0xff]  }
  0x2d   : > { %s2494_s27 = sshll.u32 %s3318_s10, 5  ;;  %2522 = vmatprep.subr.bf16.mxu0 %v2625_v8  ;;  %s2495_s14 = sshll.u32 %s3318_s10, 6  ;;  %v681_v20 = vunpack.c.l.s4 %v2628_v19  ;;  %vm838_vm3 = vcmask 130048   ;;  %vm840_vm4 = vcmask 261120   ;;  %vm842_vm5 = vcmask 392192  }
  0x2e   : > { %s357_s11 = scalar_lea.vmem %s3300_s0, %s2494_s27  ;;  %s362_s17 = scalar_lea.vmem %s3301_s1, %s2495_s14  ;;  %v650_v25 = vunpack.c.0.s8 %v649_v15  ;;  %vm844_vm6 = vcmask 523264   ;;  %vm846_vm7 = vcmask 654336   ;;  %vm848_vm8 = vcmask 785408  }
  0x2f   : > { %v369_v1 = vld [vmem:[%s357_s11] sm:$0xff]  ;;  %v370_v2 = vld [vmem:[%s357_s11 + $0x8] sm:$0xff]  ;;  %v371_v5 = vld [vmem:[%s357_s11 + $0x10] sm:$0xff]  ;;  %v682_v29 = vunpack.c.0.s8 %v681_v20  ;;  %s2630_s19 = smov 64   ;;  %s2631_s20 = smov 16   ;;  %vm850_vm9 = vcmask 916480  }
  0x30   : > { %v2497_v4 = vpack.c.bf16 %v370_v2, %v369_v1  ;;  %v372_v6 = vld [vmem:[%s357_s11 + $0x18] sm:$0xff]  ;;  %v639_v9 = vld [vmem:[%s362_s17 + $0x8] sm:$0xff]  ;;  %v638_v16 = vld [vmem:[%s362_s17] sm:$0xff]  ;;  %v2767_v33 = vsub.s32 %v650_v25, %v2764_v18  ;;  %s2632_s21 = smov 48   ;;  %s2633_s24 = smov 80  }
  0x31   : > { %v2498_v7 = vpack.c.bf16 %v372_v6, %v371_v5  ;;  %v641_v10 = vld [vmem:[%s362_s17 + $0x18] sm:$0xff]  ;;  %v643_v11 = vld [vmem:[%s362_s17 + $0x28] sm:$0xff]  ;;  %v640_v17 = vld [vmem:[%s362_s17 + $0x10] sm:$0xff]  ;;  %v2770_v34 = vsub.s32 %v682_v29, %v2764_v18  ;;  %s2634_s25 = smov 96   ;;  %s2635_s26 = smov 112  }
  0x32   : > { %2512 = vmatprep.mubr.msk.bf16.mxu0 %vm388_vm1, %v2497_v4  ;;  %v645_v13 = vld [vmem:[%s362_s17 + $0x38] sm:$0xff]  ;;  %v714_v21 = vcombine.low %v639_v9, %v643_v11  ;;  %v715_v22 = vcombine.high %v639_v9, %v643_v11  ;;  %v642_v23 = vld [vmem:[%s362_s17 + $0x20] sm:$0xff]  ;;  %v644_v24 = vld [vmem:[%s362_s17 + $0x30] sm:$0xff]  ;;  %s2637_s27 = smov 17   ;;  %s2638_s28 = smov 15  }
  0x33   : > { %2513 = vmatmul.mubr.msk.bf16.vlgmr.msra.gmra.mrb[0].mxu0 %vm388_vm1, %v2498_v7  ;;  %v730_v26 = vcombine.low %v641_v10, %v645_v13  ;;  %v646_v27 = vcombine.low %v638_v16, %v642_v23  ;;  %v662_v28 = vcombine.low %v640_v17, %v644_v24  ;;  %v731_v30 = vcombine.high %v641_v10, %v645_v13  ;;  %s2639_s29 = smov 1   ;;  %s2640_s11 = smov 127  }
  0x34   : > { %2524 = vmatprep.mubr.msk.bf16.mxu0 %vm2626_vm2, %v2625_v8  ;;  %v647_v31 = vcombine.high %v638_v16, %v642_v23  ;;  %v663_v32 = vcombine.high %v640_v17, %v644_v24  ;;  %v722_v35 = vrot.slane %v714_v21, %v2767_v33  ;;  %v2777_v39 = vrot.slane %v715_v22, %v2767_v33  ;;  %s2641_s12 = smov 113   ;;  %s2642_s13 = smov 111  }
  0x35   : > { %v738_v36 = vrot.slane %v730_v26, %v2767_v33  ;;  %v654_v37 = vrot.slane %v646_v27, %v2767_v33  ;;  %v670_v38 = vrot.slane %v662_v28, %v2767_v33  ;;  %v2780_v40 = vrot.slane %v731_v30, %v2767_v33 }
  0x36   : > { %v2783_v41 = vrot.slane %v647_v31, %v2767_v33  ;;  %v2786_v42 = vrot.slane %v663_v32, %v2767_v33 }
  0x37   : > { %v747_v43 = vcombine.high %v722_v35, %v738_v36  ;;  %v746_v44 = vcombine.low %v722_v35, %v738_v36  ;;  %v679_v45 = vcombine.high %v654_v37, %v670_v38  ;;  %v678_v46 = vcombine.low %v654_v37, %v670_v38 }
  0x38   : > { %v762_v47 = vcombine.low %v2777_v39, %v2780_v40  ;;  %v694_v48 = vcombine.low %v2783_v41, %v2786_v42 }
  0x39   : > { %v761_v49 = vrot.slane %v747_v43, %v2770_v34  ;;  %v693_v50 = vrot.slane %v679_v45, %v2770_v34  ;;  %v2795_v51 = vrot.slane %v746_v44, %v2770_v34  ;;  %v2802_v54 = vrot.slane %v678_v46, %v2770_v34 }
  0x3a   : > { %v770_v52 = vrot.slane %v762_v47, %v2770_v34  ;;  %v702_v53 = vrot.slane %v694_v48, %v2770_v34 }
  0x3b   : > { %815 = vrot.lane.b32.xlu1 %v761_v49, %s2629_s18  ;;  %787 = vrot.lane.b32.xlu0 %v693_v50, %s2629_s18  ;;  %v778_v55 = vcombine.high %v2795_v51, %v2625_v8  ;;  %v710_v56 = vcombine.high %v2802_v54, %v2625_v8  ;;  %v779_v57 = vcombine.high %v761_v49, %v2625_v8 }
  0x3c   : > { %v711_v58 = vcombine.high %v693_v50, %v2625_v8  ;;  %v780_v9 = vcombine.high %v770_v52, %v2625_v8  ;;  %v712_v10 = vcombine.high %v702_v53, %v2625_v8 }
  0x3f   : > { %823 = vrot.lane.b32.xlu1 %v770_v52, %s2630_s19  ;;  %795 = vrot.lane.b32.xlu0 %v702_v53, %s2630_s19 }
  0x43   : > { %811 = vrot.lane.b32.xlu1 %v778_v55, %s2631_s20  ;;  %783 = vrot.lane.b32.xlu0 %v710_v56, %s2631_s20 }
  0x47   : > { %819 = vrot.lane.b32.xlu1 %v779_v57, %s2632_s21  ;;  %791 = vrot.lane.b32.xlu0 %v711_v58, %s2632_s21 }
  0x4b   : > { %827 = vrot.lane.b32.xlu1 %v780_v9, %s2633_s24  ;;  %799 = vrot.lane.b32.xlu0 %v712_v10, %s2633_s24  ;;  %v695_v10 = vcombine.high %v2783_v41, %v2786_v42 }
  0xad   : > { %v816_v42 = vpop.permute.xlu1 %815 }
 0x106   : > { %v2514_v59 = vpop.f32.mrb[0].mxu0 }
 0x107   : > { %v433_v60 = vpop.f32.mrb[1].mxu0  ;;  %v450_v0 = vpack.c.bf16 %v2514_v59, %v2514_v59 }
 0x108   : > { %v448_v61 = vpack.c.bf16 %v433_v60, %v433_v60  ;;  %v2515_v62 = vpop.f32.mrb[2].mxu0 }
 0x109   : > { %v436_v63 = vpop.f32.mrb[3].mxu0  ;;  %v451_v4 = vpack.c.bf16 %v2515_v62, %v2515_v62  ;;  %v551_v6 = vsel %vm395_vm0, %v450_v0, 0 }
 0x10a   : > { %v449_v1 = vpack.c.bf16 %v436_v63, %v436_v63  ;;  %v463_v2 = vsel %vm395_vm0, %v448_v61, 0 }
 0x10b   : > { %2517 = vmatpush3.bf16.msra.mxu1 %v463_v2  ;;  %v595_v7 = vsel %vm395_vm0, %v451_v4, 0 }
 0x10c   : > { %v507_v5 = vsel %vm395_vm0, %v449_v1, 0  ;;  %2528 = vmatprep.subr.bf16.mxu1 %v2625_v8 }
 0x10d   : > { %2523 = vmatpush3.bf16.msra.mxu0 %v507_v5 }
 0x10e   : > { %2519 = vmatmul.mubr.msk.bf16.vlgmr.msra.gmra.mrb[0].mxu1 %vm388_vm1, %v2581_v3  ;;  %2534 = vmatprep.subr.bf16.mxu0 %v2625_v8 }
 0x10f   : > { %2529 = vmatpush3.bf16.msra.mxu1 %v551_v6  ;;  %2530 = vmatprep.mubr.msk.bf16.mxu1 %vm2626_vm2, %v2625_v8 }
 0x110   : > { %2525 = vmatmul.mubr.msk.bf16.vlgmr.msra.gmra.mrb[4].mxu0 %vm388_vm1, %v2581_v3 }
 0x111   : > { %2535 = vmatpush3.bf16.msra.mxu0 %v595_v7  ;;  %2536 = vmatprep.mubr.msk.bf16.mxu0 %vm2626_vm2, %v2625_v8 }
 0x116   : > { %2531 = vmatmul.mubr.msk.bf16.vlgmr.msra.gmra.mrb[4].mxu1 %vm388_vm1, %v2581_v3 }
 0x118   : > { %2537 = vmatmul.mubr.msk.bf16.vlgmr.msra.gmra.mrb[8].mxu0 %vm388_vm1, %v2581_v3  ;;  %v763_v3 = vcombine.high %v2777_v39, %v2780_v40 }
 0x11a   : > { %v777_v6 = vrot.slane %v763_v3, %v2770_v34 }
 0x1e1   : > { %v499_v11 = vpop.f32.mrb[0].mxu1 }
 0x1e2   : > { %v2520_v13 = vpop.f32.mrb[1].mxu1 }
 0x1e3   : > { %v502_v14 = vpop.f32.mrb[2].mxu1  ;;  %v543_v15 = vpop.f32.mrb[4].mxu0 }
 0x1e4   : > { %v2521_v16 = vpop.f32.mrb[3].mxu1  ;;  %v2526_v17 = vpop.f32.mrb[5].mxu0 }
 0x1e5   : > { %v546_v19 = vpop.f32.mrb[6].mxu0  ;;  %v781_v16 = vcombine.high %v777_v6, %v2625_v8  ;;  %v788_v17 = vpop.permute.xlu0 %787 }
 0x1e6   : > { %v2527_v20 = vpop.f32.mrb[7].mxu0 }
 0x1e9   : > { %v587_v21 = vpop.f32.mrb[4].mxu1  ;;  %v796_v20 = vpop.permute.xlu0 %795 }
 0x1ea   : > { %v859_v22 = vcombine.low %v499_v11, %v587_v21  ;;  %v860_v23 = vcombine.high %v499_v11, %v587_v21  ;;  %v2532_v24 = vpop.f32.mrb[5].mxu1 }
 0x1eb   : > { %v590_v25 = vpop.f32.mrb[6].mxu1  ;;  %v631_v26 = vpop.f32.mrb[8].mxu0 }
 0x1ec   : > { %v927_v27 = vcombine.low %v502_v14, %v590_v25  ;;  %v928_v28 = vcombine.high %v502_v14, %v590_v25  ;;  %v2533_v29 = vpop.f32.mrb[7].mxu1  ;;  %v2538_v30 = vpop.f32.mrb[9].mxu0  ;;  %v875_v31 = vcombine.low %v543_v15, %v631_v26  ;;  %v876_v32 = vcombine.high %v543_v15, %v631_v26 }
 0x1ed   : > { %v634_v35 = vpop.f32.mrb[10].mxu0  ;;  %v867_v43 = vrot.slane %v859_v22, %v2767_v33  ;;  %v874_v44 = vrot.slane %v860_v23, %v2767_v33  ;;  %v709_v14 = vrot.slane %v695_v10, %v2770_v34 }
 0x1ee   : > { %v943_v36 = vcombine.low %v546_v19, %v634_v35  ;;  %v944_v37 = vcombine.high %v546_v19, %v634_v35  ;;  %v2539_v38 = vpop.f32.mrb[11].mxu0  ;;  %v883_v45 = vrot.slane %v875_v31, %v2767_v33  ;;  %v890_v46 = vrot.slane %v876_v32, %v2767_v33  ;;  %v824_v19 = vpop.permute.xlu1 %823 }
 0x1ef   : > { %v935_v47 = vrot.slane %v927_v27, %v2767_v33  ;;  %v942_v48 = vrot.slane %v928_v28, %v2767_v33  ;;  %v713_v41 = vcombine.high %v709_v14, %v2625_v8 }
 0x1f0   : > { %v951_v49 = vrot.slane %v943_v36, %v2767_v33  ;;  %v958_v50 = vrot.slane %v944_v37, %v2767_v33  ;;  %v891_v52 = vcombine.low %v867_v43, %v883_v45  ;;  %v892_v53 = vcombine.high %v867_v43, %v883_v45 }
 0x1f1   : > { %v907_v55 = vcombine.low %v874_v44, %v890_v46  ;;  %v908_v56 = vcombine.high %v874_v44, %v890_v46 }
 0x1f2   : > { %v959_v57 = vcombine.low %v935_v47, %v951_v49  ;;  %v960_v58 = vcombine.high %v935_v47, %v951_v49  ;;  %v975_v59 = vcombine.low %v942_v48, %v958_v50  ;;  %v976_v60 = vcombine.high %v942_v48, %v958_v50  ;;  %v812_v21 = vpop.permute.xlu1 %811 }
 0x1f3   : > { %v915_v61 = vrot.slane %v907_v55, %v2770_v34  ;;  %v906_v62 = vrot.slane %v892_v53, %v2770_v34  ;;  %v922_v63 = vrot.slane %v908_v56, %v2770_v34  ;;  %v899_v0 = vrot.slane %v891_v52, %v2770_v34 }
 0x1f4   : > { %v974_v33 = vrot.slane %v960_v58, %v2770_v34  ;;  %v983_v2 = vrot.slane %v975_v59, %v2770_v34  ;;  %v990_v5 = vrot.slane %v976_v60, %v2770_v34  ;;  %v967_v40 = vrot.slane %v959_v57, %v2770_v34  ;;  %v784_v34 = vpop.permute.xlu0 %783 }
 0x1f5   : > { %1008 = vrot.lane.b32.xlu0 %v915_v61, %s2630_s19  ;;  %1000 = vrot.lane.b32.xlu1 %v906_v62, %s2629_s18  ;;  %v923_v1 = vcombine.high %v899_v0, %v2625_v8  ;;  %v924_v4 = vcombine.high %v906_v62, %v2625_v8  ;;  %v925_v7 = vcombine.high %v915_v61, %v2625_v8 }
 0x1f6   : > { %v926_v9 = vcombine.high %v922_v63, %v2625_v8  ;;  %v992_v39 = vcombine.high %v974_v33, %v2625_v8  ;;  %v993_v11 = vcombine.high %v983_v2, %v2625_v8  ;;  %v991_v13 = vcombine.high %v967_v40, %v2625_v8  ;;  %v820_v22 = vpop.permute.xlu1 %819 }
 0x1f7   : > { %v994_v15 = vcombine.high %v990_v5, %v2625_v8  ;;  %v852_v38 = vsel %vm838_vm3, %v2795_v51, %v812_v21  ;;  %v839_v43 = vsel %vm838_vm3, %v2802_v54, %v784_v34 }
 0x1f8   : > { %v792_v23 = vpop.permute.xlu0 %791  ;;  %v853_v47 = vsel %vm840_vm4, %v852_v38, %v816_v42  ;;  %v841_v49 = vsel %vm840_vm4, %v839_v43, %v788_v17  ;;  %v2962_v42 = vand.u32 127, %v651_v12  ;;  %v2965_v17 = vsub.s32 0, %v2764_v18 }
 0x1f9   : > { %1016 = vrot.lane.b32.xlu0 %v922_v63, %s2634_s25  ;;  %1028 = vrot.lane.b32.xlu1 %v974_v33, %s2629_s18  ;;  %v854_v50 = vsel %vm842_vm5, %v853_v47, %v820_v22  ;;  %v843_v54 = vsel %vm842_vm5, %v841_v49, %v792_v23  ;;  %v1082_v22 = vld [vmem:[#allocation2] ss:$8 sm:$0x3]  ;;  %v2440_v47 = vld [vmem:[%s3305_s5 + $0x2] sm:$0x3] }
 0x1fa   : > { %v828_v24 = vpop.permute.xlu1 %827  ;;  %v855_v59 = vsel %vm844_vm6, %v854_v50, %v824_v19  ;;  %v845_v60 = vsel %vm844_vm6, %v843_v54, %v796_v20  ;;  %v2968_v19 = vsub.s32 1, %v2764_v18  ;;  %v1107_v20 = vld [vmem:[#allocation2 + $0x1] ss:$8 sm:$0x3]  ;;  %vm1103_vm10 = vcmp.lt.s32.totalorder %v2962_v42, 16 }
 0x1fb   : > { %v856_v3 = vsel %vm846_vm7, %v855_v59, %v828_v24  ;;  %v2972_v21 = vrot.slane %v1107_v20, %v2965_v17  ;;  %vm1079_vm11 = vcmp.lt.s32.totalorder %v2962_v42, 17  ;;  %vm1229_vm12 = vcmp.lt.s32.totalorder %v2962_v42, 15  ;;  %v1445_v59 = vld [vmem:[#allocation2 + $0x5] ss:$8 sm:$0x3] }
 0x1fc   : > { %v800_v25 = vpop.permute.xlu0 %799  ;;  %v2975_v34 = vrot.slane %v1107_v20, %v2968_v19  ;;  %vm1307_vm13 = vcmp.lt.s32.totalorder %v2962_v42, 1  ;;  %vm1441_vm14 = vcmp.lt.s32.totalorder %v2962_v42, 127  ;;  %vm1519_vm15 = vcmp.lt.s32.totalorder %v2962_v42, 113 }
 0x1fd   : > { %996 = vrot.lane.b32.xlu0 %v923_v1, %s2631_s20  ;;  %1036 = vrot.lane.b32.xlu1 %v983_v2, %s2630_s19  ;;  %vm1597_vm2 = vcmp.lt.s32.totalorder %v2962_v42, 112 }
 0x201   : > { %1004 = vrot.lane.b32.xlu0 %v924_v4, %s2632_s21  ;;  %1044 = vrot.lane.b32.xlu1 %v990_v5, %s2634_s25  ;;  %v847_v4 = vsel %vm846_vm7, %v845_v60, %v800_v25  ;;  %v1096_v60 = vld [vmem:[%s3305_s5] sm:$0x3] }
 0x205   : > { %1012 = vrot.lane.b32.xlu0 %v925_v7, %s2633_s24  ;;  %831 = vrot.lane.b32.xlu1 %v777_v6, %s2634_s25  ;;  %v2636_v6 = vmov 0  }
 0x206   : > { %1166 = vmatprep.mubr.bf16.mxu1 %v2636_v6  ;;  %1216 = vmatprep.mubr.bf16.mxu0 %v2636_v6 }
 0x207   : > { %2580 = vset.pattern.permute.xlu0 %v2636_v6 }
 0x209   : > { %1020 = vrot.lane.b32.xlu0 %v926_v9, %s2635_s26  ;;  %1032 = vrot.lane.b32.xlu1 %v992_v39, %s2632_s21 }
 0x20d   : > { %1040 = vrot.lane.b32.xlu1 %v993_v11, %s2633_s24  ;;  %1024 = vrot.lane.b32.xlu0 %v991_v13, %s2631_s20 }
 0x211   : > { %1048 = vrot.lane.b32.xlu1 %v994_v15, %s2635_s26  ;;  %803 = vrot.lane.b32.xlu0 %v709_v14, %s2634_s25 }
 0x215   : > { %835 = vrot.lane.b32.xlu1 %v781_v16, %s2635_s26  ;;  %807 = vrot.lane.b32.xlu0 %v713_v41, %s2635_s26  ;;  %v1749_v41 = vld [vmem:[%s3306_s6] sm:$0xf] }
 0x267   : > { %v1009_v26 = vpop.permute.xlu0 %1008  ;;  %v1001_v27 = vpop.permute.xlu1 %1000 }
 0x26b   : > { %v1017_v28 = vpop.permute.xlu0 %1016  ;;  %v1029_v29 = vpop.permute.xlu1 %1028 }
 0x26f   : > { %v997_v30 = vpop.permute.xlu0 %996  ;;  %v1037_v8 = vpop.permute.xlu1 %1036 }
 0x270   : > { %v1051_v37 = vsel %vm838_vm3, %v899_v0, %v997_v30 }
 0x271   : > { %v1052_v44 = vsel %vm840_vm4, %v1051_v37, %v1001_v27  ;;  %v2985_v27 = vrot.slane %v1082_v22, %v2965_v17 }
 0x273   : > { %v1005_v31 = vpop.permute.xlu0 %1004  ;;  %v1045_v32 = vpop.permute.xlu1 %1044 }
 0x274   : > { %v1053_v48 = vsel %vm842_vm5, %v1052_v44, %v1005_v31 }
 0x275   : > { %v1054_v51 = vsel %vm844_vm6, %v1053_v48, %v1009_v26 }
 0x277   : > { %v1013_v35 = vpop.permute.xlu0 %1012  ;;  %v832_v36 = vpop.permute.xlu1 %831 }
 0x278   : > { %v1055_v55 = vsel %vm846_vm7, %v1054_v51, %v1013_v35  ;;  %v857_v7 = vsel %vm848_vm8, %v856_v3, %v832_v36 }
 0x279   : > { %v1056_v61 = vsel %vm848_vm8, %v1055_v55, %v1017_v28  ;;  %v2988_v28 = vrot.slane %v1082_v22, %v2968_v19 }
 0x27b   : > { %v1021_v45 = vpop.permute.xlu0 %1020  ;;  %v1033_v46 = vpop.permute.xlu1 %1032 }
 0x27c   : > { %v1057_v0 = vsel %vm850_vm9, %v1056_v61, %v1021_v45 }
 0x27d   : > { %v1067_v9 = vrot.slane %v1057_v0, 4 }
 0x27f   : > { %v1041_v52 = vpop.permute.xlu1 %1040  ;;  %v1025_v53 = vpop.permute.xlu0 %1024 }
 0x280   : > { %v1058_v56 = vsel %vm838_vm3, %v967_v40, %v1025_v53  ;;  %vm1675_vm3 = vcmp.lt.s32.totalorder %v2962_v42, 111 }
 0x281   : > { %v1059_v57 = vsel %vm840_vm4, %v1058_v56, %v1029_v29  ;;  %v1233_v29 = vld [vmem:[#allocation2 + $0x2] ss:$8 sm:$0x3] }
 0x282   : > { %v1060_v58 = vsel %vm842_vm5, %v1059_v57, %v1033_v46  ;;  %v2996_v37 = vrot.slane %v1233_v29, %v2965_v17  ;;  %v3003_v45 = vrot.slane %v1233_v29, %v2968_v19  ;;  %v1311_v46 = vld [vmem:[#allocation2 + $0x3] ss:$8 sm:$0x3] }
 0x283   : > { %v1049_v62 = vpop.permute.xlu1 %1048  ;;  %v1061_v63 = vsel %vm844_vm6, %v1060_v58, %v1037_v8  ;;  %v804_v33 = vpop.permute.xlu0 %803  ;;  %v3014_v54 = vrot.slane %v1311_v46, %v2965_v17  ;;  %v3022_v58 = vrot.slane %v1311_v46, %v2968_v19 }
 0x284   : > { %v1062_v1 = vsel %vm846_vm7, %v1061_v63, %v1041_v52  ;;  %v849_v40 = vsel %vm848_vm8, %v847_v4, %v804_v33  ;;  %v3038_v4 = vrot.slane %v1445_v59, %v2965_v17 }
 0x285   : > { %v1063_v2 = vsel %vm848_vm8, %v1062_v1, %v1045_v32 }
 0x286   : > { %v1064_v5 = vsel %vm850_vm9, %v1063_v2, %v1049_v62 }
 0x287   : > { %v1068_v39 = vrot.slane %v1064_v5, 4  ;;  %v836_v10 = vpop.permute.xlu1 %835  ;;  %v808_v11 = vpop.permute.xlu0 %807 }
 0x288   : > { %v858_v13 = vsel %vm850_vm9, %v857_v7, %v836_v10  ;;  %v851_v14 = vsel %vm850_vm9, %v849_v40, %v808_v11  ;;  %v1523_v40 = vld [vmem:[#allocation2 + $0x6] ss:$8 sm:$0x3]  ;;  %v2445_v10 = vld [vmem:[%s3305_s5 + $0x4] sm:$0x3] }
 0x289   : > { %v2921_v15 = vsel %vm395_vm0, %v858_v13, %v1068_v39  ;;  %v2924_v16 = vsel %vm395_vm0, %v851_v14, %v1067_v9  ;;  %v3046_v39 = vrot.slane %v1445_v59, %v2968_v19  ;;  %v3060_v22 = vrot.slane %v1523_v40, %v2965_v17 }
 0x28a   : > { %1101 = vrot.lane.b32.xlu1 %v2921_v15, %s2631_s20  ;;  %1099 = vrot.lane.b32.xlu0 %v2924_v16, %s2631_s20  ;;  %v1384_v0 = vpack.c.bf16 %v2921_v15, %v2921_v15  ;;  %v1383_v1 = vpack.c.bf16 %v2924_v16, %v2924_v16 }
 0x28e   : > { %1075 = vrot.lane.b32.xlu1 %v2921_v15, %s2637_s27  ;;  %1073 = vrot.lane.b32.xlu0 %v2924_v16, %s2637_s27 }
 0x292   : > { %1227 = vrot.lane.b32.xlu1 %v2921_v15, %s2638_s28  ;;  %1225 = vrot.lane.b32.xlu0 %v2924_v16, %s2638_s28 }
 0x296   : > { %1305 = vrot.lane.b32.xlu1 %v2921_v15, %s2639_s29  ;;  %1303 = vrot.lane.b32.xlu0 %v2924_v16, %s2639_s29 }
 0x29a   : > { %1439 = vrot.lane.b32.xlu1 %v2921_v15, %s2640_s11  ;;  %1437 = vrot.lane.b32.xlu0 %v2924_v16, %s2640_s11 }
 0x29e   : > { %1517 = vrot.lane.b32.xlu1 %v2921_v15, %s2641_s12  ;;  %1515 = vrot.lane.b32.xlu0 %v2924_v16, %s2641_s12 }
 0x2a2   : > { %1595 = vrot.lane.b32.xlu1 %v2921_v15, %s2635_s26  ;;  %1593 = vrot.lane.b32.xlu0 %v2924_v16, %s2635_s26 }
 0x2a6   : > { %1673 = vrot.lane.b32.xlu1 %v2921_v15, %s2642_s13  ;;  %1671 = vrot.lane.b32.xlu0 %v2924_v16, %s2642_s13  ;;  %v1389_v16 = vsel %vm395_vm0, %v1383_v1, 0 }
 0x2aa   : > { %1752 = vperm.xlu0 %2580, %v1749_v41  }
 0x2fc   : > { %v1102_v23 = vpop.permute.xlu1 %1101  ;;  %v1100_v24 = vpop.permute.xlu0 %1099 }
 0x2fd   : > { %v1104_v12 = vsel %vm1103_vm10, %v1100_v24, %v1102_v23  ;;  %v1105_v25 = vsel %vm1103_vm10, %v1102_v23, %v1100_v24 }
 0x2fe   : > { %v1119_v18 = vmul.f32 %v2972_v21, %v1105_v25  ;;  %v1120_v26 = vmul.f32 %v2975_v34, %v1104_v12  ;;  %v3068_v25 = vrot.slane %v1523_v40, %v2968_v19 }
 0x300   : > { %v1123_v30 = vpack.c.bf16 %v1119_v18, %v1119_v18  ;;  %v1124_v8 = vpack.c.bf16 %v1120_v26, %v1120_v26  ;;  %v1076_v31 = vpop.permute.xlu1 %1075  ;;  %v1074_v32 = vpop.permute.xlu0 %1073  ;;  %v1601_v18 = vld [vmem:[#allocation2 + $0x7] ss:$8 sm:$0x3] }
 0x301   : > { %v1080_v35 = vsel %vm1079_vm11, %v1074_v32, %v1076_v31  ;;  %v1081_v36 = vsel %vm1079_vm11, %v1076_v31, %v1074_v32  ;;  %v2448_v26 = vld [vmem:[%s3305_s5 + $0x6] sm:$0x3]  ;;  %v3088_v46 = vrot.slane %v1601_v18, %v2968_v19 }
 0x302   : > { %v1094_v38 = vmul.f32 %v2985_v27, %v1081_v36  ;;  %v1095_v43 = vmul.f32 %v2988_v28, %v1080_v35  ;;  %2441 = vmatprep.subr.msk.bf16.mxu1 %vm395_vm0, %v1124_v8  ;;  %v1129_v44 = vsel %vm395_vm0, %v1123_v30, 0  ;;  %v3080_v36 = vrot.slane %v1601_v18, %v2965_v17 }
 0x303   : > { %1135 = vmatpush1.bf16.msra.mxu1 %v1129_v44 }
 0x304   : > { %v1097_v48 = vpack.c.bf16 %v1094_v38, %v1094_v38  ;;  %v1098_v49 = vpack.c.bf16 %v1095_v43, %v1095_v43  ;;  %v1228_v50 = vpop.permute.xlu1 %1227  ;;  %v1226_v51 = vpop.permute.xlu0 %1225 }
 0x305   : > { %v1230_v52 = vsel %vm1229_vm12, %v1226_v51, %v1228_v50  ;;  %v1231_v53 = vsel %vm1229_vm12, %v1228_v50, %v1226_v51 }
 0x306   : > { %v1245_v55 = vmul.f32 %v2996_v37, %v1231_v53  ;;  %v1246_v56 = vmul.f32 %v3003_v45, %v1230_v52  ;;  %2442 = vmatmul.mubr.msk.bf16.vlgmr.msra.gmra.mrb[8].mxu1 %vm388_vm1, %v2440_v47  ;;  %2443 = vmatprep.subr.msk.bf16.mxu0 %vm395_vm0, %v1098_v49  ;;  %v1179_v57 = vsel %vm395_vm0, %v1097_v48, 0  ;;  %v1679_v47 = vld [vmem:[#allocation2 + $0x10] ss:$8 sm:$0x3]  ;;  %v2451_v48 = vld [vmem:[%s3305_s5 + $0x8] sm:$0x3] }
 0x307   : > { %1185 = vmatpush1.bf16.msra.mxu0 %v1179_v57  ;;  %1292 = vmatprep.mubr.bf16.mxu1 %v2636_v6 }
 0x308   : > { %v1249_v61 = vpack.c.bf16 %v1245_v55, %v1245_v55  ;;  %v1250_v62 = vpack.c.bf16 %v1246_v56, %v1246_v56  ;;  %v1306_v63 = vpop.permute.xlu1 %1305  ;;  %v1304_v33 = vpop.permute.xlu0 %1303  ;;  %v3100_v56 = vrot.slane %v1679_v47, %v2965_v17 }
 0x309   : > { %v1308_v2 = vsel %vm1307_vm13, %v1304_v33, %v1306_v63  ;;  %v1309_v3 = vsel %vm1307_vm13, %v1306_v63, %v1304_v33 }
 0x30a   : > { %v1323_v5 = vmul.f32 %v3014_v54, %v1309_v3  ;;  %v1324_v7 = vmul.f32 %v3022_v58, %v1308_v2  ;;  %2444 = vmatmul.mubr.msk.bf16.vlgmr.msra.gmra.mrb[12].mxu0 %vm388_vm1, %v1096_v60  ;;  %2446 = vmatprep.subr.msk.bf16.mxu1 %vm395_vm0, %v1250_v62  ;;  %v1255_v9 = vsel %vm395_vm0, %v1249_v61, 0  ;;  %v3108_v61 = vrot.slane %v1679_v47, %v2968_v19  ;;  %v2454_v62 = vld [vmem:[%s3305_s5 + $0xa] sm:$0x3] }
 0x30b   : > { %1261 = vmatpush1.bf16.msra.mxu1 %v1255_v9  ;;  %1370 = vmatprep.mubr.bf16.mxu0 %v2636_v6 }
 0x30c   : > { %v1327_v11 = vpack.c.bf16 %v1323_v5, %v1323_v5  ;;  %v1328_v13 = vpack.c.bf16 %v1324_v7, %v1324_v7  ;;  %v1440_v14 = vpop.permute.xlu1 %1439  ;;  %2452 = vmatprep.subr.msk.bf16.mxu1 %vm395_vm0, %v1384_v0  ;;  %v1438_v15 = vpop.permute.xlu0 %1437  ;;  %v2457_v7 = vld [vmem:[%s3305_s5 + $0xc] sm:$0x3] }
 0x30d   : > { %v1442_v41 = vsel %vm1441_vm14, %v1438_v15, %v1440_v14  ;;  %v1443_v20 = vsel %vm1441_vm14, %v1440_v14, %v1438_v15 }
 0x30e   : > { %v1457_v23 = vmul.f32 %v3038_v4, %v1442_v41  ;;  %v1458_v24 = vmul.f32 %v3046_v39, %v1443_v20  ;;  %2447 = vmatmul.mubr.msk.bf16.vlgmr.msra.gmra.mrb[12].mxu1 %vm388_vm1, %v2445_v10  ;;  %2449 = vmatprep.subr.msk.bf16.mxu0 %vm395_vm0, %v1328_v13  ;;  %v1333_v12 = vsel %vm395_vm0, %v1327_v11, 0  ;;  %v2460_v11 = vld [vmem:[%s3305_s5 + $0xe] sm:$0x3]  ;;  %v2463_v13 = vld [vmem:[%s3305_s5 + $0x10] sm:$0x3] }
 0x30f   : > { %1339 = vmatpush1.bf16.msra.mxu0 %v1333_v12  ;;  %1395 = vmatpush1.bf16.msra.mxu1 %v1389_v16 }
 0x310   : > { %v1461_v29 = vpack.c.bf16 %v1457_v23, %v1457_v23  ;;  %v1462_v30 = vpack.c.bf16 %v1458_v24, %v1458_v24  ;;  %v1518_v8 = vpop.permute.xlu1 %1517  ;;  %v1516_v31 = vpop.permute.xlu0 %1515  ;;  %1426 = vmatprep.mubr.bf16.mxu1 %v2636_v6 }
 0x311   : > { %v1520_v32 = vsel %vm1519_vm15, %v1516_v31, %v1518_v8  ;;  %v1521_v35 = vsel %vm1519_vm15, %v1518_v8, %v1516_v31 }
 0x312   : > { %v1535_v38 = vmul.f32 %v3060_v22, %v1520_v32  ;;  %v1536_v43 = vmul.f32 %v3068_v25, %v1521_v35  ;;  %2450 = vmatmul.mubr.msk.bf16.vlgmr.msra.gmra.mrb[16].mxu0 %vm388_vm1, %v2448_v26  ;;  %2455 = vmatprep.subr.msk.bf16.mxu0 %vm395_vm0, %v1462_v30  ;;  %v1467_v44 = vsel %vm395_vm0, %v1461_v29, 0 }
 0x313   : > { %1473 = vmatpush1.bf16.msra.mxu0 %v1467_v44  ;;  %1504 = vmatprep.mubr.bf16.mxu0 %v2636_v6 }
 0x314   : > { %v1539_v49 = vpack.c.bf16 %v1535_v38, %v1535_v38  ;;  %v1540_v50 = vpack.c.bf16 %v1536_v43, %v1536_v43  ;;  %v1596_v51 = vpop.permute.xlu1 %1595  ;;  %v1594_v52 = vpop.permute.xlu0 %1593 }
 0x315   : > { %v1598_v53 = vsel %vm1597_vm2, %v1594_v52, %v1596_v51  ;;  %v1599_v55 = vsel %vm1597_vm2, %v1596_v51, %v1594_v52 }
 0x316   : > { %v1613_v57 = vmul.f32 %v3080_v36, %v1598_v53  ;;  %v1614_v59 = vmul.f32 %v3088_v46, %v1599_v55  ;;  %2453 = vmatmul.mubr.msk.bf16.vlgmr.msra.gmra.mrb[16].mxu1 %vm388_vm1, %v2451_v48  ;;  %2458 = vmatprep.subr.msk.bf16.mxu1 %vm395_vm0, %v1540_v50  ;;  %v1545_v60 = vsel %vm395_vm0, %v1539_v49, 0 }
 0x317   : > { %1551 = vmatpush1.bf16.msra.mxu1 %v1545_v60  ;;  %1582 = vmatprep.mubr.bf16.mxu1 %v2636_v6 }
 0x318   : > { %v1617_v17 = vpack.c.bf16 %v1613_v57, %v1613_v57  ;;  %v1618_v63 = vpack.c.bf16 %v1614_v59, %v1614_v59  ;;  %v1674_v33 = vpop.permute.xlu1 %1673  ;;  %v1672_v0 = vpop.permute.xlu0 %1671 }
 0x319   : > { %v1676_v1 = vsel %vm1675_vm3, %v1672_v0, %v1674_v33  ;;  %v1677_v2 = vsel %vm1675_vm3, %v1674_v33, %v1672_v0 }
 0x31a   : > { %v1691_v19 = vmul.f32 %v3100_v56, %v1676_v1  ;;  %v1692_v3 = vmul.f32 %v3108_v61, %v1677_v2  ;;  %2456 = vmatmul.mubr.msk.bf16.vlgmr.msra.gmra.mrb[20].mxu0 %vm388_vm1, %v2454_v62  ;;  %2461 = vmatprep.subr.msk.bf16.mxu0 %vm395_vm0, %v1618_v63  ;;  %v1623_v5 = vsel %vm395_vm0, %v1617_v17, 0 }
 0x31b   : > { %1629 = vmatpush1.bf16.msra.mxu0 %v1623_v5  ;;  %1660 = vmatprep.mubr.bf16.mxu0 %v2636_v6 }
 0x31c   : > { %v1695_v9 = vpack.c.bf16 %v1691_v19, %v1691_v19  ;;  %v1696_v40 = vpack.c.bf16 %v1692_v3, %v1692_v3 }
 0x31e   : > { %2459 = vmatmul.mubr.msk.bf16.vlgmr.msra.gmra.mrb[20].mxu1 %vm388_vm1, %v2457_v7  ;;  %2464 = vmatprep.subr.msk.bf16.mxu1 %vm395_vm0, %v1696_v40  ;;  %v1701_v10 = vsel %vm395_vm0, %v1695_v9, 0  ;;  %vm1786_vm0 = vcmask 1041408  }
 0x31f   : > { %1707 = vmatpush1.bf16.msra.mxu1 %v1701_v10  ;;  %1738 = vmatprep.mubr.bf16.mxu1 %v2636_v6 }
 0x322   : > { %2462 = vmatmul.mubr.msk.bf16.vlgmr.msra.gmra.mrb[24].mxu0 %vm388_vm1, %v2460_v11 }
 0x323   : > { %1825 = vmatprep.mubr.bf16.mxu0 %v2636_v6 }
 0x326   : > { %2465 = vmatmul.mubr.msk.bf16.vlgmr.msra.gmra.mrb[24].mxu1 %vm388_vm1, %v2463_v13  ;;  %vm1782_vm1 = vcmask 31744  }
 0x327   : > { %1875 = vmatprep.mubr.bf16.mxu1 %v2636_v6 }
 0x3d9   : > { %v1168_v14 = vpop.f32.mrb[8].mxu1 }
 0x3da   : > { %v1170_v15 = vpop.f32.mrb[9].mxu1 }
 0x3db   : > { %v1172_v16 = vpop.f32.mrb[10].mxu1 }
 0x3dc   : > { %v1173_v41 = vpop.f32.mrb[11].mxu1 }
 0x3dd   : > { %v1218_v20 = vpop.f32.mrb[12].mxu0 }
 0x3de   : > { %v1219_v23 = vadd.f32 %v1218_v20, %v1168_v14  ;;  %v1220_v24 = vpop.f32.mrb[13].mxu0 }
 0x3df   : > { %v1221_v12 = vadd.f32 %v1220_v24, %v1170_v15  ;;  %v1222_v18 = vpop.f32.mrb[14].mxu0  ;;  %v1753_v15 = vpop.permute.xlu0 %1752 }
 0x3e0   : > { %v1223_v26 = vpop.f32.mrb[15].mxu0 }
 0x3e1   : > { %v1294_v29 = vpop.f32.mrb[12].mxu1 }
 0x3e2   : > { %v1301_v30 = vadd.f32 %v1294_v29, %v1219_v23  ;;  %v1296_v8 = vpop.f32.mrb[13].mxu1 }
 0x3e3   : > { %v1302_v31 = vadd.f32 %v1296_v8, %v1221_v12  ;;  %v1298_v32 = vpop.f32.mrb[14].mxu1 }
 0x3e4   : > { %v1299_v35 = vpop.f32.mrb[15].mxu1 }
 0x3e5   : > { %v1372_v38 = vpop.f32.mrb[16].mxu0 }
 0x3e6   : > { %v1379_v43 = vadd.f32 %v1372_v38, %v1301_v30  ;;  %v1374_v44 = vpop.f32.mrb[17].mxu0  ;;  %v2324_v30 = vld [vmem:[%s3308_s8] sm:$0xf] }
 0x3e7   : > { %v1380_v47 = vadd.f32 %v1374_v44, %v1302_v31  ;;  %v1376_v48 = vpop.f32.mrb[18].mxu0 }
 0x3e8   : > { %v1377_v49 = vpop.f32.mrb[19].mxu0 }
 0x3e9   : > { %v1428_v50 = vpop.f32.mrb[16].mxu1 }
 0x3ea   : > { %v1435_v51 = vadd.f32 %v1428_v50, %v1379_v43  ;;  %v1430_v52 = vpop.f32.mrb[17].mxu1 }
 0x3eb   : > { %v1436_v53 = vadd.f32 %v1430_v52, %v1380_v47  ;;  %v1432_v55 = vpop.f32.mrb[18].mxu1 }
 0x3ec   : > { %v1433_v57 = vpop.f32.mrb[19].mxu1 }
 0x3ed   : > { %v1506_v59 = vpop.f32.mrb[20].mxu0 }
 0x3ee   : > { %v1513_v60 = vadd.f32 %v1506_v59, %v1435_v51  ;;  %v1508_v62 = vpop.f32.mrb[21].mxu0 }
 0x3ef   : > { %v1514_v17 = vadd.f32 %v1508_v62, %v1436_v53  ;;  %v1510_v63 = vpop.f32.mrb[22].mxu0 }
 0x3f0   : > { %v1511_v33 = vpop.f32.mrb[23].mxu0 }
 0x3f1   : > { %v1584_v0 = vpop.f32.mrb[20].mxu1 }
 0x3f2   : > { %v1591_v1 = vadd.f32 %v1584_v0, %v1513_v60  ;;  %v1586_v2 = vpop.f32.mrb[21].mxu1 }
 0x3f3   : > { %v1592_v19 = vadd.f32 %v1586_v2, %v1514_v17  ;;  %v1588_v3 = vpop.f32.mrb[22].mxu1 }
 0x3f4   : > { %v1589_v5 = vpop.f32.mrb[23].mxu1 }
 0x3f5   : > { %v1662_v7 = vpop.f32.mrb[24].mxu0 }
 0x3f6   : > { %v1669_v9 = vadd.f32 %v1662_v7, %v1591_v1  ;;  %v1664_v40 = vpop.f32.mrb[25].mxu0  ;;  %v1767_v1 = vld [vmem:[%s3307_s7] sm:$0x3] }
 0x3f7   : > { %v1670_v10 = vadd.f32 %v1664_v40, %v1592_v19  ;;  %v1666_v11 = vpop.f32.mrb[26].mxu0 }
 0x3f8   : > { %v1667_v13 = vpop.f32.mrb[27].mxu0  ;;  %v2471_v11 = vld [vmem:[%s3307_s7 + $0x4] sm:$0x3] }
 0x3f9   : > { %v1740_v14 = vpop.f32.mrb[24].mxu1 }
 0x3fa   : > { %v1747_v16 = vadd.f32 %v1740_v14, %v1669_v9  ;;  %v1742_v41 = vpop.f32.mrb[25].mxu1 }
 0x3fb   : > { %v1748_v20 = vadd.f32 %v1742_v41, %v1670_v10  ;;  %v1744_v23 = vpop.f32.mrb[26].mxu1 }
 0x3fc   : > { %v1755_v24 = vadd.f32 %v1753_v15, %v1747_v16  ;;  %v1745_v12 = vpop.f32.mrb[27].mxu1 }
 0x3fd   : > { %v1756_v18 = vadd.f32 %v1753_v15, %v1748_v20  ;;  %v2474_v12 = vld [vmem:[%s3307_s7 + $0x6] sm:$0x3] }
 0x3fe   : > { %v3141_v26 = vmax.f32 %v1755_v24, 0.0 }
 0x3ff   : > { %v3147_v29 = vmax.f32 %v1756_v18, 0.0 }
 0x400   : > { %1759 = vrot.lane.b32.xlu0 %v3141_v26, %s2637_s27  ;;  %1770 = vrot.lane.b32.xlu1 %v3141_v26, %s2631_s20  ;;  %v2014_v5 = vpack.c.bf16 %v3141_v26, %v3141_v26 }
 0x401   : > { %v2015_v10 = vpack.c.bf16 %v3147_v29, %v3147_v29 }
 0x402   : > { %v2020_v24 = vsel %vm1786_vm0, %v2014_v5, 0 }
 0x404   : > { %1884 = vrot.lane.b32.xlu0 %v3141_v26, %s2638_s28  ;;  %1772 = vrot.lane.b32.xlu1 %v3147_v29, %s2631_s20 }
 0x408   : > { %1948 = vrot.lane.b32.xlu0 %v3141_v26, %s2639_s29  ;;  %1761 = vrot.lane.b32.xlu1 %v3147_v29, %s2637_s27  ;;  %s2496_s27 = sshll.u32 %s3318_s10, 3 }
 0x40c   : > { %2068 = vrot.lane.b32.xlu0 %v3141_v26, %s2640_s11  ;;  %1886 = vrot.lane.b32.xlu1 %v3147_v29, %s2638_s28 }
 0x410   : > { %2132 = vrot.lane.b32.xlu0 %v3141_v26, %s2641_s12  ;;  %1950 = vrot.lane.b32.xlu1 %v3147_v29, %s2639_s29  ;;  %s367_s29 = scalar_lea.vmem %s3309_s9, %s2496_s27 }
 0x414   : > { %2196 = vrot.lane.b32.xlu0 %v3141_v26, %s2635_s26  ;;  %2070 = vrot.lane.b32.xlu1 %v3147_v29, %s2640_s11 }
 0x418   : > { %2260 = vrot.lane.b32.xlu0 %v3141_v26, %s2642_s13  ;;  %2134 = vrot.lane.b32.xlu1 %v3147_v29, %s2641_s12 }
 0x41c   : > { %2327 = vperm.xlu0 %2580, %v2324_v30   ;;  %2198 = vrot.lane.b32.xlu1 %v3147_v29, %s2635_s26 }
 0x420   : > { %2262 = vrot.lane.b32.xlu1 %v3147_v29, %s2642_s13 }
 0x472   : > { %v1760_v8 = vpop.permute.xlu0 %1759  ;;  %v1771_v31 = vpop.permute.xlu1 %1770 }
 0x476   : > { %v1885_v32 = vpop.permute.xlu0 %1884  ;;  %v1773_v35 = vpop.permute.xlu1 %1772 }
 0x477   : > { %v1774_v38 = vsel %vm1103_vm10, %v1771_v31, %v1773_v35  ;;  %v1775_v43 = vsel %vm1103_vm10, %v1773_v35, %v1771_v31  ;;  %v2477_v35 = vld [vmem:[%s3307_s7 + $0x8] sm:$0x3] }
 0x478   : > { %v1776_v44 = vmul.f32 %v1775_v43, %v2972_v21  ;;  %v1777_v47 = vmul.f32 %v1774_v38, %v2975_v34  ;;  %v2466_v34 = vld [vmem:[%s3307_s7 + $0x2] sm:$0x3] }
 0x47a   : > { %v1780_v48 = vpack.c.bf16 %v1776_v44, %v1776_v44  ;;  %v1781_v49 = vpack.c.bf16 %v1777_v47, %v1777_v47  ;;  %v1949_v50 = vpop.permute.xlu0 %1948  ;;  %v1762_v51 = vpop.permute.xlu1 %1761 }
 0x47b   : > { %v1763_v52 = vsel %vm1079_vm11, %v1760_v8, %v1762_v51  ;;  %v1764_v53 = vsel %vm1079_vm11, %v1762_v51, %v1760_v8 }
 0x47c   : > { %v1765_v55 = vmul.f32 %v1764_v53, %v2985_v27  ;;  %v1766_v57 = vmul.f32 %v1763_v52, %v2988_v28  ;;  %2467 = vmatprep.subr.msk.bf16.mxu0 %vm1786_vm0, %v1781_v49  ;;  %v1788_v21 = vsel %vm1786_vm0, %v1780_v48, 0 }
 0x47d   : > { %1794 = vmatpush1.bf16.msra.mxu0 %v1788_v21 }
 0x47e   : > { %v1768_v59 = vpack.c.bf16 %v1765_v55, %v1765_v55  ;;  %v1769_v60 = vpack.c.bf16 %v1766_v57, %v1766_v57  ;;  %v1887_v62 = vpop.permute.xlu1 %1886  ;;  %v2069_v28 = vpop.permute.xlu0 %2068 }
 0x47f   : > { %v1888_v17 = vsel %vm1229_vm12, %v1885_v32, %v1887_v62  ;;  %v1889_v27 = vsel %vm1229_vm12, %v1887_v62, %v1885_v32  ;;  %v2489_v62 = vld [vmem:[%s3307_s7 + $0x10] sm:$0x3] }
 0x480   : > { %v1890_v63 = vmul.f32 %v1889_v27, %v2996_v37  ;;  %v1891_v33 = vmul.f32 %v1888_v17, %v3003_v45  ;;  %2468 = vmatmul.mubr.msk.bf16.vlgmr.msra.gmra.mrb[28].mxu0 %vm1782_vm1, %v2466_v34  ;;  %2469 = vmatprep.subr.msk.bf16.mxu1 %vm1786_vm0, %v1769_v60  ;;  %v1838_v0 = vsel %vm1786_vm0, %v1768_v59, 0  ;;  %v2483_v59 = vld [vmem:[%s3307_s7 + $0xc] sm:$0x3] }
 0x481   : > { %1844 = vmatpush1.bf16.msra.mxu1 %v1838_v0  ;;  %1937 = vmatprep.mubr.bf16.mxu0 %v2636_v6 }
 0x482   : > { %v1894_v2 = vpack.c.bf16 %v1890_v63, %v1890_v63  ;;  %v1895_v19 = vpack.c.bf16 %v1891_v33, %v1891_v33  ;;  %v1951_v3 = vpop.permute.xlu1 %1950  ;;  %v2133_v13 = vpop.permute.xlu0 %2132 }
 0x483   : > { %v1952_v37 = vsel %vm1307_vm13, %v1949_v50, %v1951_v3  ;;  %v1953_v45 = vsel %vm1307_vm13, %v1951_v3, %v1949_v50  ;;  %v2480_v50 = vld [vmem:[%s3307_s7 + $0xa] sm:$0x3] }
 0x484   : > { %v1954_v7 = vmul.f32 %v1953_v45, %v3014_v54  ;;  %v1955_v9 = vmul.f32 %v1952_v37, %v3022_v58  ;;  %2470 = vmatmul.mubr.msk.bf16.vlgmr.msra.gmra.mrb[28].mxu1 %vm1782_vm1, %v1767_v1  ;;  %2472 = vmatprep.subr.msk.bf16.mxu0 %vm1786_vm0, %v1895_v19  ;;  %v1900_v40 = vsel %vm1786_vm0, %v1894_v2, 0 }
 0x485   : > { %1906 = vmatpush1.bf16.msra.mxu0 %v1900_v40  ;;  %2001 = vmatprep.mubr.bf16.mxu1 %v2636_v6 }
 0x486   : > { %v1958_v54 = vpack.c.bf16 %v1954_v7, %v1954_v7  ;;  %v1959_v14 = vpack.c.bf16 %v1955_v9, %v1955_v9  ;;  %2478 = vmatprep.subr.msk.bf16.mxu0 %vm1786_vm0, %v2015_v10  ;;  %v2071_v58 = vpop.permute.xlu1 %2070  ;;  %v2197_v30 = vpop.permute.xlu0 %2196 }
 0x487   : > { %v2072_v15 = vsel %vm1441_vm14, %v2069_v28, %v2071_v58  ;;  %v2073_v16 = vsel %vm1441_vm14, %v2071_v58, %v2069_v28 }
 0x488   : > { %v2074_v41 = vmul.f32 %v2072_v15, %v3038_v4  ;;  %v2075_v20 = vmul.f32 %v2073_v16, %v3046_v39  ;;  %2473 = vmatmul.mubr.msk.bf16.vlgmr.msra.gmra.mrb[32].mxu0 %vm1782_vm1, %v2471_v11  ;;  %2475 = vmatprep.subr.msk.bf16.mxu1 %vm1786_vm0, %v1959_v14  ;;  %v1964_v23 = vsel %vm1786_vm0, %v1958_v54, 0 }
 0x489   : > { %1970 = vmatpush1.bf16.msra.mxu1 %v1964_v23  ;;  %2026 = vmatpush1.bf16.msra.mxu0 %v2020_v24 }
 0x48a   : > { %v2078_v18 = vpack.c.bf16 %v2074_v41, %v2074_v41  ;;  %v2079_v26 = vpack.c.bf16 %v2075_v20, %v2075_v20  ;;  %v2135_v29 = vpop.permute.xlu1 %2134  ;;  %2057 = vmatprep.mubr.bf16.mxu0 %v2636_v6  ;;  %v2261_v51 = vpop.permute.xlu0 %2260 }
 0x48b   : > { %v2136_v4 = vsel %vm1519_vm15, %v2133_v13, %v2135_v29  ;;  %v2137_v39 = vsel %vm1519_vm15, %v2135_v29, %v2133_v13 }
 0x48c   : > { %v2138_v8 = vmul.f32 %v2136_v4, %v3060_v22  ;;  %v2139_v31 = vmul.f32 %v2137_v39, %v3068_v25  ;;  %2476 = vmatmul.mubr.msk.bf16.vlgmr.msra.gmra.mrb[32].mxu1 %vm1782_vm1, %v2474_v12  ;;  %2481 = vmatprep.subr.msk.bf16.mxu1 %vm1786_vm0, %v2079_v26  ;;  %v2084_v32 = vsel %vm1786_vm0, %v2078_v18, 0 }
 0x48d   : > { %2090 = vmatpush1.bf16.msra.mxu1 %v2084_v32  ;;  %2121 = vmatprep.mubr.bf16.mxu1 %v2636_v6 }
 0x48e   : > { %v2142_v38 = vpack.c.bf16 %v2138_v8, %v2138_v8  ;;  %v2143_v43 = vpack.c.bf16 %v2139_v31, %v2139_v31  ;;  %v2199_v44 = vpop.permute.xlu1 %2198 }
 0x48f   : > { %v2200_v22 = vsel %vm1597_vm2, %v2197_v30, %v2199_v44  ;;  %v2201_v25 = vsel %vm1597_vm2, %v2199_v44, %v2197_v30 }
 0x490   : > { %v2202_v47 = vmul.f32 %v2200_v22, %v3080_v36  ;;  %v2203_v48 = vmul.f32 %v2201_v25, %v3088_v46  ;;  %2479 = vmatmul.mubr.msk.bf16.vlgmr.msra.gmra.mrb[36].mxu0 %vm1782_vm1, %v2477_v35  ;;  %2484 = vmatprep.subr.msk.bf16.mxu0 %vm1786_vm0, %v2143_v43  ;;  %v2148_v49 = vsel %vm1786_vm0, %v2142_v38, 0 }
 0x491   : > { %2154 = vmatpush1.bf16.msra.mxu0 %v2148_v49  ;;  %2185 = vmatprep.mubr.bf16.mxu0 %v2636_v6 }
 0x492   : > { %v2206_v52 = vpack.c.bf16 %v2202_v47, %v2202_v47  ;;  %v2207_v53 = vpack.c.bf16 %v2203_v48, %v2203_v48  ;;  %v2263_v55 = vpop.permute.xlu1 %2262 }
 0x493   : > { %v2264_v36 = vsel %vm1675_vm3, %v2261_v51, %v2263_v55  ;;  %v2265_v46 = vsel %vm1675_vm3, %v2263_v55, %v2261_v51 }
 0x494   : > { %v2266_v57 = vmul.f32 %v2264_v36, %v3100_v56  ;;  %v2267_v21 = vmul.f32 %v2265_v46, %v3108_v61  ;;  %2482 = vmatmul.mubr.msk.bf16.vlgmr.msra.gmra.mrb[36].mxu1 %vm1782_vm1, %v2480_v50  ;;  %2487 = vmatprep.subr.msk.bf16.mxu1 %vm1786_vm0, %v2207_v53  ;;  %v2212_v34 = vsel %vm1786_vm0, %v2206_v52, 0  ;;  %v2486_v61 = vld [vmem:[%s3307_s7 + $0xe] sm:$0x3] }
 0x495   : > { %2218 = vmatpush1.bf16.msra.mxu1 %v2212_v34  ;;  %2249 = vmatprep.mubr.bf16.mxu1 %v2636_v6 }
 0x496   : > { %v2270_v60 = vpack.c.bf16 %v2266_v57, %v2266_v57  ;;  %v2271_v42 = vpack.c.bf16 %v2267_v21, %v2267_v21 }
 0x498   : > { %2485 = vmatmul.mubr.msk.bf16.vlgmr.msra.gmra.mrb[40].mxu0 %vm1782_vm1, %v2483_v59  ;;  %2490 = vmatprep.subr.msk.bf16.mxu0 %vm1786_vm0, %v2271_v42  ;;  %v2276_v56 = vsel %vm1786_vm0, %v2270_v60, 0 }
 0x499   : > { %2282 = vmatpush1.bf16.msra.mxu0 %v2276_v56  ;;  %2313 = vmatprep.mubr.bf16.mxu0 %v2636_v6 }
 0x49b   : > { %v2328_v51 = vpop.permute.xlu0 %2327 }
 0x49c   : > { %2488 = vmatmul.mubr.msk.bf16.vlgmr.msra.gmra.mrb[40].mxu1 %vm1782_vm1, %v2486_v61 }
 0x4a0   : > { %2491 = vmatmul.mubr.msk.bf16.vlgmr.msra.gmra.mrb[44].mxu0 %vm1782_vm1, %v2489_v62 }
 0x553   : > { %v1827_v17 = vpop.f32.mrb[28].mxu0 }
 0x554   : > { %v1829_v27 = vpop.f32.mrb[29].mxu0 }
 0x555   : > { %v1831_v28 = vpop.f32.mrb[30].mxu0 }
 0x556   : > { %v1832_v63 = vpop.f32.mrb[31].mxu0 }
 0x557   : > { %v1877_v33 = vpop.f32.mrb[28].mxu1 }
 0x558   : > { %v1878_v0 = vadd.f32 %v1877_v33, %v1827_v17  ;;  %v1879_v1 = vpop.f32.mrb[29].mxu1 }
 0x559   : > { %v1880_v2 = vadd.f32 %v1879_v1, %v1829_v27  ;;  %v1881_v19 = vpop.f32.mrb[30].mxu1 }
 0x55a   : > { %v1882_v3 = vpop.f32.mrb[31].mxu1 }
 0x55b   : > { %v1939_v37 = vpop.f32.mrb[32].mxu0 }
 0x55c   : > { %v1946_v6 = vadd.f32 %v1939_v37, %v1878_v0  ;;  %v1941_v45 = vpop.f32.mrb[33].mxu0 }
 0x55d   : > { %v1947_v5 = vadd.f32 %v1941_v45, %v1880_v2  ;;  %v1943_v7 = vpop.f32.mrb[34].mxu0 }
 0x55e   : > { %v1944_v9 = vpop.f32.mrb[35].mxu0 }
 0x55f   : > { %v2003_v40 = vpop.f32.mrb[32].mxu1 }
 0x560   : > { %v2010_v10 = vadd.f32 %v2003_v40, %v1946_v6  ;;  %v2005_v11 = vpop.f32.mrb[33].mxu1 }
 0x561   : > { %v2011_v13 = vadd.f32 %v2005_v11, %v1947_v5  ;;  %v2007_v54 = vpop.f32.mrb[34].mxu1 }
 0x562   : > { %v2008_v14 = vpop.f32.mrb[35].mxu1 }
 0x563   : > { %v2059_v58 = vpop.f32.mrb[36].mxu0 }
 0x564   : > { %v2066_v15 = vadd.f32 %v2059_v58, %v2010_v10  ;;  %v2061_v16 = vpop.f32.mrb[37].mxu0 }
 0x565   : > { %v2067_v41 = vadd.f32 %v2061_v16, %v2011_v13  ;;  %v2063_v20 = vpop.f32.mrb[38].mxu0 }
 0x566   : > { %v2064_v23 = vpop.f32.mrb[39].mxu0 }
 0x567   : > { %v2123_v24 = vpop.f32.mrb[36].mxu1 }
 0x568   : > { %v2130_v12 = vadd.f32 %v2123_v24, %v2066_v15  ;;  %v2125_v18 = vpop.f32.mrb[37].mxu1 }
 0x569   : > { %v2131_v26 = vadd.f32 %v2125_v18, %v2067_v41  ;;  %v2127_v29 = vpop.f32.mrb[38].mxu1 }
 0x56a   : > { %v2128_v4 = vpop.f32.mrb[39].mxu1 }
 0x56b   : > { %v2187_v39 = vpop.f32.mrb[40].mxu0 }
 0x56c   : > { %v2194_v30 = vadd.f32 %v2187_v39, %v2130_v12  ;;  %v2189_v8 = vpop.f32.mrb[41].mxu0 }
 0x56d   : > { %v2195_v31 = vadd.f32 %v2189_v8, %v2131_v26  ;;  %v2191_v32 = vpop.f32.mrb[42].mxu0 }
 0x56e   : > { %v2192_v35 = vpop.f32.mrb[43].mxu0 }
 0x56f   : > { %v2251_v38 = vpop.f32.mrb[40].mxu1 }
 0x570   : > { %v2258_v43 = vadd.f32 %v2251_v38, %v2194_v30  ;;  %v2253_v44 = vpop.f32.mrb[41].mxu1 }
 0x571   : > { %v2259_v22 = vadd.f32 %v2253_v44, %v2195_v31  ;;  %v2255_v25 = vpop.f32.mrb[42].mxu1 }
 0x572   : > { %v2256_v47 = vpop.f32.mrb[43].mxu1 }
 0x573   : > { %v2315_v48 = vpop.f32.mrb[44].mxu0 }
 0x574   : > { %v2322_v49 = vadd.f32 %v2315_v48, %v2258_v43  ;;  %v2317_v50 = vpop.f32.mrb[45].mxu0 }
 0x575   : > { %v2323_v52 = vadd.f32 %v2317_v50, %v2259_v22  ;;  %v2319_v53 = vpop.f32.mrb[46].mxu0 }
 0x576   : > { %v2330_v55 = vadd.f32 %v2328_v51, %v2322_v49  ;;  %v2320_v36 = vpop.f32.mrb[47].mxu0 }
 0x577   : > { %v2331_v46 = vadd.f32 %v2328_v51, %v2323_v52 }
 0x578   : > { %v2332_v57 = vmax.f32 %v2330_v55, 0.0 }
 0x579   : > { %v2333_v21 = vmax.f32 %v2331_v46, 0.0 }
 0x57b   : > { %v2336_v34 = vcombine.low %v2332_v57, %v2333_v21 }
 0x57d   : > { %2338 = vst [vmem:[%s367_s29] sm:$0xff] %v2336_v34 }
 0x57e PF: > { %s20_s30 = sadd.s32 1, %s2620_s30  }
 0x57f   : > { %p17_p3 = scmp.ge.s32.totalorder %s20_s30, 4  }
 0x581   :  { %19 = sbr.rel (!%p17_p3) target bundleno = 1 (0x1), region = 117 }
 0x588   :  { %2360 = vsyncpa [#allocation3], 1 }
 0x589   :  { %2362 = vsyncpa [#allocation3 + $0x1], 1 }

</bundles_post_ra>
